<compile_context>
chip_gen: v6e
topology: v6e:2x2x1
jax: 0.10.0
libtpu: 0.0.40
codegen_flags: <defaults>
</compile_context>

<pallas_src>
import math

import jax
import jax.numpy as jnp
from jax.experimental import pallas as pl
from jax.experimental.pallas import tpu as pltpu


def _make_realnvp_kernel(num_flows, Dh):
    """Kernel closed over the static flow count / half-dimension."""

    D = 2 * Dh
    log2pi_term = 0.5 * D * math.log(2.0 * math.pi)

    def kernel(x_ref, w1_ref, b1_ref, w2_ref, b2_ref, z_ref, nll_ref):
        B = x_ref.shape[0]

        # State halves in the "folded" (flip-free) frame.
        p = x_ref[:, :Dh]
        q = x_ref[:, Dh:]
        logdet = jnp.zeros((B, 1), jnp.float32)

        # Static unroll over flows; all weights already resident in VMEM.
        for f in range(num_flows):
            w1 = w1_ref[f]          # (Dh, 2H)   = [W1_s | W1_t]   (flip folded)
            b1 = b1_ref[f]          # (1, 2H)
            w2 = w2_ref[f]          # (2H, 2Dh)  = blockdiag(W2_s, W2_t)
            b2 = b2_ref[f]          # (1, 2Dh)

            h = jnp.tanh(jnp.dot(p, w1, preferred_element_type=jnp.float32) + b1)
            raw = jnp.dot(h, w2, preferred_element_type=jnp.float32) + b2
            s = jnp.tanh(raw[:, :Dh])     # scaling net output
            t = raw[:, Dh:]               # transition net output

            new_p = (q - t) * jnp.exp(-s)       # forward coupling
            q = p
            p = new_p
            logdet = logdet - jnp.sum(s, axis=1, keepdims=True)

        # Write the two halves directly (no concatenate / extra (B,D) temp).
        z_ref[:, :Dh] = p
        z_ref[:, Dh:] = q

        # Standard-normal prior log_prob (reversal-invariant -> no flip needed).
        sq = (jnp.sum(p * p, axis=1, keepdims=True)
              + jnp.sum(q * q, axis=1, keepdims=True))
        log_prob = -0.5 * sq - log2pi_term
        nll_per = -(log_prob + logdet)                 # (B, 1)
        nll_ref[0, 0] = jnp.sum(nll_per)               # scalar -> SMEM output

    return kernel


def _fold_and_fuse(params):
    """Host-side weight prep.

    For odd flows, fold the feature flip into the coupling nets
    (S~ = R o S o R): reverse the rows of the first-layer weights and the
    output columns of the second-layer weights / biases.  Then fuse the two
    nets: one wide first layer [W1_s | W1_t] and one block-diagonal second
    layer blockdiag(W2_s, W2_t).
    """
    ws1, bs1, ws2, bs2 = params["ws1"], params["bs1"], params["ws2"], params["bs2"]
    wt1, bt1, wt2, bt2 = params["wt1"], params["bt1"], params["wt2"], params["bt2"]
    nf = ws1.shape[0]
    odd = (jnp.arange(nf) % 2 == 1)

    def fold_in(w):   # reverse input rows (Dh axis) for odd flows
        return jnp.where(odd[:, None, None], w[:, ::-1, :], w)

    def fold_out(w):  # reverse output cols (Dh axis) for odd flows
        return jnp.where(odd[:, None, None], w[:, :, ::-1], w)

    ws1e, wt1e = fold_in(ws1), fold_in(wt1)
    ws2e, wt2e = fold_out(ws2), fold_out(wt2)
    bs2e, bt2e = fold_out(bs2), fold_out(bt2)

    w1f = jnp.concatenate([ws1e, wt1e], axis=2)                   # (nf, Dh, 2H)
    b1f = jnp.concatenate([bs1, bt1], axis=2)                     # (nf, 1, 2H)
    zeros = jnp.zeros_like(ws2e)                                  # (nf, H, Dh)
    w2f = jnp.concatenate(
        [jnp.concatenate([ws2e, zeros], axis=2),
         jnp.concatenate([zeros, wt2e], axis=2)], axis=1)         # (nf, 2H, 2Dh)
    b2f = jnp.concatenate([bs2e, bt2e], axis=2)                   # (nf, 1, 2Dh)
    return w1f, b1f, w2f, b2f


def realnvp_forward(x, params, num_flows, reduction="avg"):
    """Returns the scalar NLL (matches RealNVP.forward) and the latent z."""
    B, D = x.shape
    Dh = D // 2
    w1f, b1f, w2f, b2f = _fold_and_fuse(params)

    kernel = _make_realnvp_kernel(num_flows, Dh)
    z_k, nll_sum = pl.pallas_call(
        kernel,
        out_shape=(jax.ShapeDtypeStruct((B, D), jnp.float32),
                   jax.ShapeDtypeStruct((1, 1), jnp.float32)),
        in_specs=[pl.BlockSpec(memory_space=pltpu.MemorySpace.VMEM)] * 5,
        out_specs=(pl.BlockSpec(memory_space=pltpu.MemorySpace.VMEM),
                   pl.BlockSpec(memory_space=pltpu.MemorySpace.SMEM)),
    )(x.astype(jnp.float32), w1f, b1f, w2f, b2f)

    # Undo the folded permutation parity on the latent (one-off, in JAX).
    if num_flows % 2 == 1:
        z = jnp.concatenate(
            [z_k[:, :Dh][:, ::-1], z_k[:, Dh:][:, ::-1]], axis=1)
    else:
        z = z_k

    nll = nll_sum[0, 0]
    if reduction == "sum":
        return nll, z
    return nll / B, z


def realnvp_forward_ref(x, params, num_flows, reduction="avg"):
    """Pure-JAX reference mirroring the PyTorch module semantics."""
    B, D = x.shape
    Dh = D // 2
    z = x.astype(jnp.float32)
    logdet = jnp.zeros((B,), jnp.float32)
    for i in range(num_flows):
        x_a, x_b = z[:, :Dh], z[:, Dh:]
        h = jnp.tanh(x_a @ params["ws1"][i] + params["bs1"][i, 0])
        s = jnp.tanh(h @ params["ws2"][i] + params["bs2"][i, 0])
        h = jnp.tanh(x_a @ params["wt1"][i] + params["bt1"][i, 0])
        t = h @ params["wt2"][i] + params["bt2"][i, 0]
        y_b = (x_b - t) * jnp.exp(-s)
        z = jnp.concatenate([x_a, y_b], axis=1)[:, ::-1]   # flip(1)
        logdet = logdet - jnp.sum(s, axis=1)
    log_prob = -0.5 * jnp.sum(z * z, axis=1) - 0.5 * D * jnp.log(2.0 * jnp.pi)
    res = -(log_prob + logdet)
    return (jnp.sum(res) if reduction == "sum" else jnp.mean(res)), z


def make_params(key, num_flows, Dh, H):
    ks = jax.random.split(key, 8)
    scale = 0.1
    return {
        "ws1": scale * jax.random.normal(ks[0], (num_flows, Dh, H), jnp.float32),
        "bs1": scale * jax.random.normal(ks[1], (num_flows, 1, H), jnp.float32),
        "ws2": scale * jax.random.normal(ks[2], (num_flows, H, Dh), jnp.float32),
        "bs2": scale * jax.random.normal(ks[3], (num_flows, 1, Dh), jnp.float32),
        "wt1": scale * jax.random.normal(ks[4], (num_flows, Dh, H), jnp.float32),
        "bt1": scale * jax.random.normal(ks[5], (num_flows, 1, H), jnp.float32),
        "wt2": scale * jax.random.normal(ks[6], (num_flows, H, Dh), jnp.float32),
        "bt2": scale * jax.random.normal(ks[7], (num_flows, 1, Dh), jnp.float32),
    }


if __name__ == "__main__":
    B, D, H, NUM_FLOWS = 8, 256, 128, 4  # D even; D/2 = 128 (lane-aligned)
    key = jax.random.PRNGKey(0)
    k_x, k_p = jax.random.split(key)
    x = jax.random.normal(k_x, (B, D), jnp.float32)
    params = make_params(k_p, NUM_FLOWS, D // 2, H)

    # Even flow count (final parity = identity).
    nll, z = realnvp_forward(x, params, NUM_FLOWS, reduction="avg")
    nll = jax.block_until_ready(nll)
    z = jax.block_until_ready(z)
    nll_ref, z_ref = realnvp_forward_ref(x, params, NUM_FLOWS, reduction="avg")
    assert jnp.allclose(nll, nll_ref, rtol=1e-4, atol=1e-4), (nll, nll_ref)
    assert jnp.allclose(z, z_ref, rtol=1e-4, atol=1e-4)

    # Odd flow count exercises the final-parity unfold path and 'sum' reduction.
    NF3 = 3
    params3 = {k: v[:NF3] for k, v in params.items()}
    nll3, z3 = realnvp_forward(x, params3, NF3, reduction="sum")
    nll3 = jax.block_until_ready(nll3)
    z3 = jax.block_until_ready(z3)
    nll3_ref, z3_ref = realnvp_forward_ref(x, params3, NF3, reduction="sum")
    assert jnp.allclose(nll3, nll3_ref, rtol=1e-4, atol=1e-4), (nll3, nll3_ref)
    assert jnp.allclose(z3, z3_ref, rtol=1e-4, atol=1e-4)

    # TODO(synk): inverse_layer / sample() (generative path) are not part of
    # forward(); not implemented here.
    print("KERNEL_OK")
</pallas_src>

<mosaic_0001>
module attributes {stable_mosaic.version = 11 : i64} {
  func.func @kernel(%arg0: memref<8x256xf32, #tpu.memory_space<vmem>>, %arg1: memref<4x128x256xf32, #tpu.memory_space<vmem>>, %arg2: memref<4x1x256xf32, #tpu.memory_space<vmem>>, %arg3: memref<4x256x256xf32, #tpu.memory_space<vmem>>, %arg4: memref<4x1x256xf32, #tpu.memory_space<vmem>>, %arg5: memref<8x256xf32, #tpu.memory_space<vmem>>, %arg6: memref<1x1xf32, #tpu.memory_space<smem>>) attributes {dimension_semantics = [], scalar_prefetch = 0 : i64, scratch_operands = 0 : i64, tpu.core_type = #tpu.core_type<tc>} {
    %c0 = arith.constant 0 : index
    %c0_0 = arith.constant 0 : index
    %0 = vector.load %arg0[%c0, %c0_0] : memref<8x256xf32, #tpu.memory_space<vmem>>, vector<8x128xf32>
    %c0_1 = arith.constant 0 : index
    %c128 = arith.constant 128 : index
    %1 = vector.load %arg0[%c0_1, %c128] : memref<8x256xf32, #tpu.memory_space<vmem>>, vector<8x128xf32>
    %cst = arith.constant 0.000000e+00 : f32
    %2 = vector.broadcast %cst : f32 to vector<8x1xf32>
    %c0_2 = arith.constant 0 : index
    %c0_3 = arith.constant 0 : index
    %c0_4 = arith.constant 0 : index
    %3 = vector.load %arg1[%c0_2, %c0_3, %c0_4] : memref<4x128x256xf32, #tpu.memory_space<vmem>>, vector<1x128x256xf32>
    %4 = vector.shape_cast %3 : vector<1x128x256xf32> to vector<128x256xf32>
    %c0_5 = arith.constant 0 : index
    %c0_6 = arith.constant 0 : index
    %c0_7 = arith.constant 0 : index
    %5 = vector.load %arg2[%c0_5, %c0_6, %c0_7] : memref<4x1x256xf32, #tpu.memory_space<vmem>>, vector<1x1x256xf32>
    %6 = vector.shape_cast %5 : vector<1x1x256xf32> to vector<1x256xf32>
    %c0_8 = arith.constant 0 : index
    %c0_9 = arith.constant 0 : index
    %c0_10 = arith.constant 0 : index
    %7 = vector.load %arg3[%c0_8, %c0_9, %c0_10] : memref<4x256x256xf32, #tpu.memory_space<vmem>>, vector<1x256x256xf32>
    %8 = vector.shape_cast %7 : vector<1x256x256xf32> to vector<256x256xf32>
    %c0_11 = arith.constant 0 : index
    %c0_12 = arith.constant 0 : index
    %c0_13 = arith.constant 0 : index
    %9 = vector.load %arg4[%c0_11, %c0_12, %c0_13] : memref<4x1x256xf32, #tpu.memory_space<vmem>>, vector<1x1x256xf32>
    %10 = vector.shape_cast %9 : vector<1x1x256xf32> to vector<1x256xf32>
    %cst_14 = arith.constant dense<0.000000e+00> : vector<8x256xf32>
    %11 = tpu.matmul %0, %4, %cst_14 {dimension_numbers = #tpu.dot_dimension_numbers<[1], [0], [0], [1], [0, 0, 1, 1], [], []>} : vector<8x128xf32>, vector<128x256xf32>, vector<8x256xf32> -> vector<8x256xf32>
    %12 = vector.broadcast %6 : vector<1x256xf32> to vector<8x256xf32>
    %13 = arith.addf %11, %12 : vector<8x256xf32>
    %14 = math.tanh %13 : vector<8x256xf32>
    %cst_15 = arith.constant dense<0.000000e+00> : vector<8x256xf32>
    %15 = tpu.matmul %14, %8, %cst_15 {dimension_numbers = #tpu.dot_dimension_numbers<[1], [0], [0], [1], [0, 0, 1, 1], [], []>} : vector<8x256xf32>, vector<256x256xf32>, vector<8x256xf32> -> vector<8x256xf32>
    %16 = vector.broadcast %10 : vector<1x256xf32> to vector<8x256xf32>
    %17 = arith.addf %15, %16 : vector<8x256xf32>
    %18 = vector.extract_strided_slice %17 {offsets = [0, 0], sizes = [8, 128], strides = [1, 1]} : vector<8x256xf32> to vector<8x128xf32>
    %19 = math.tanh %18 : vector<8x128xf32>
    %20 = vector.extract_strided_slice %17 {offsets = [0, 128], sizes = [8, 128], strides = [1, 1]} : vector<8x256xf32> to vector<8x128xf32>
    %21 = arith.subf %1, %20 : vector<8x128xf32>
    %cst_16 = arith.constant 0.000000e+00 : f32
    %22 = vector.broadcast %cst_16 : f32 to vector<8x128xf32>
    %23 = arith.subf %22, %19 : vector<8x128xf32>
    %24 = math.exp %23 : vector<8x128xf32>
    %25 = arith.mulf %21, %24 : vector<8x128xf32>
    %cst_17 = arith.constant dense<0.000000e+00> : vector<8xf32>
    %26 = vector.multi_reduction <add>, %19, %cst_17 [1] : vector<8x128xf32> to vector<8xf32>
    %27 = vector.shape_cast %26 : vector<8xf32> to vector<8x1xf32>
    %28 = arith.subf %2, %27 : vector<8x1xf32>
    %c1 = arith.constant 1 : index
    %c0_18 = arith.constant 0 : index
    %c0_19 = arith.constant 0 : index
    %29 = vector.load %arg1[%c1, %c0_18, %c0_19] : memref<4x128x256xf32, #tpu.memory_space<vmem>>, vector<1x128x256xf32>
    %30 = vector.shape_cast %29 : vector<1x128x256xf32> to vector<128x256xf32>
    %c1_20 = arith.constant 1 : index
    %c0_21 = arith.constant 0 : index
    %c0_22 = arith.constant 0 : index
    %31 = vector.load %arg2[%c1_20, %c0_21, %c0_22] : memref<4x1x256xf32, #tpu.memory_space<vmem>>, vector<1x1x256xf32>
    %32 = vector.shape_cast %31 : vector<1x1x256xf32> to vector<1x256xf32>
    %c1_23 = arith.constant 1 : index
    %c0_24 = arith.constant 0 : index
    %c0_25 = arith.constant 0 : index
    %33 = vector.load %arg3[%c1_23, %c0_24, %c0_25] : memref<4x256x256xf32, #tpu.memory_space<vmem>>, vector<1x256x256xf32>
    %34 = vector.shape_cast %33 : vector<1x256x256xf32> to vector<256x256xf32>
    %c1_26 = arith.constant 1 : index
    %c0_27 = arith.constant 0 : index
    %c0_28 = arith.constant 0 : index
    %35 = vector.load %arg4[%c1_26, %c0_27, %c0_28] : memref<4x1x256xf32, #tpu.memory_space<vmem>>, vector<1x1x256xf32>
    %36 = vector.shape_cast %35 : vector<1x1x256xf32> to vector<1x256xf32>
    %cst_29 = arith.constant dense<0.000000e+00> : vector<8x256xf32>
    %37 = tpu.matmul %25, %30, %cst_29 {dimension_numbers = #tpu.dot_dimension_numbers<[1], [0], [0], [1], [0, 0, 1, 1], [], []>} : vector<8x128xf32>, vector<128x256xf32>, vector<8x256xf32> -> vector<8x256xf32>
    %38 = vector.broadcast %32 : vector<1x256xf32> to vector<8x256xf32>
    %39 = arith.addf %37, %38 : vector<8x256xf32>
    %40 = math.tanh %39 : vector<8x256xf32>
    %cst_30 = arith.constant dense<0.000000e+00> : vector<8x256xf32>
    %41 = tpu.matmul %40, %34, %cst_30 {dimension_numbers = #tpu.dot_dimension_numbers<[1], [0], [0], [1], [0, 0, 1, 1], [], []>} : vector<8x256xf32>, vector<256x256xf32>, vector<8x256xf32> -> vector<8x256xf32>
    %42 = vector.broadcast %36 : vector<1x256xf32> to vector<8x256xf32>
    %43 = arith.addf %41, %42 : vector<8x256xf32>
    %44 = vector.extract_strided_slice %43 {offsets = [0, 0], sizes = [8, 128], strides = [1, 1]} : vector<8x256xf32> to vector<8x128xf32>
    %45 = math.tanh %44 : vector<8x128xf32>
    %46 = vector.extract_strided_slice %43 {offsets = [0, 128], sizes = [8, 128], strides = [1, 1]} : vector<8x256xf32> to vector<8x128xf32>
    %47 = arith.subf %0, %46 : vector<8x128xf32>
    %cst_31 = arith.constant 0.000000e+00 : f32
    %48 = vector.broadcast %cst_31 : f32 to vector<8x128xf32>
    %49 = arith.subf %48, %45 : vector<8x128xf32>
    %50 = math.exp %49 : vector<8x128xf32>
    %51 = arith.mulf %47, %50 : vector<8x128xf32>
    %cst_32 = arith.constant dense<0.000000e+00> : vector<8xf32>
    %52 = vector.multi_reduction <add>, %45, %cst_32 [1] : vector<8x128xf32> to vector<8xf32>
    %53 = vector.shape_cast %52 : vector<8xf32> to vector<8x1xf32>
    %54 = arith.subf %28, %53 : vector<8x1xf32>
    %c2 = arith.constant 2 : index
    %c0_33 = arith.constant 0 : index
    %c0_34 = arith.constant 0 : index
    %55 = vector.load %arg1[%c2, %c0_33, %c0_34] : memref<4x128x256xf32, #tpu.memory_space<vmem>>, vector<1x128x256xf32>
    %56 = vector.shape_cast %55 : vector<1x128x256xf32> to vector<128x256xf32>
    %c2_35 = arith.constant 2 : index
    %c0_36 = arith.constant 0 : index
    %c0_37 = arith.constant 0 : index
    %57 = vector.load %arg2[%c2_35, %c0_36, %c0_37] : memref<4x1x256xf32, #tpu.memory_space<vmem>>, vector<1x1x256xf32>
    %58 = vector.shape_cast %57 : vector<1x1x256xf32> to vector<1x256xf32>
    %c2_38 = arith.constant 2 : index
    %c0_39 = arith.constant 0 : index
    %c0_40 = arith.constant 0 : index
    %59 = vector.load %arg3[%c2_38, %c0_39, %c0_40] : memref<4x256x256xf32, #tpu.memory_space<vmem>>, vector<1x256x256xf32>
    %60 = vector.shape_cast %59 : vector<1x256x256xf32> to vector<256x256xf32>
    %c2_41 = arith.constant 2 : index
    %c0_42 = arith.constant 0 : index
    %c0_43 = arith.constant 0 : index
    %61 = vector.load %arg4[%c2_41, %c0_42, %c0_43] : memref<4x1x256xf32, #tpu.memory_space<vmem>>, vector<1x1x256xf32>
    %62 = vector.shape_cast %61 : vector<1x1x256xf32> to vector<1x256xf32>
    %cst_44 = arith.constant dense<0.000000e+00> : vector<8x256xf32>
    %63 = tpu.matmul %51, %56, %cst_44 {dimension_numbers = #tpu.dot_dimension_numbers<[1], [0], [0], [1], [0, 0, 1, 1], [], []>} : vector<8x128xf32>, vector<128x256xf32>, vector<8x256xf32> -> vector<8x256xf32>
    %64 = vector.broadcast %58 : vector<1x256xf32> to vector<8x256xf32>
    %65 = arith.addf %63, %64 : vector<8x256xf32>
    %66 = math.tanh %65 : vector<8x256xf32>
    %cst_45 = arith.constant dense<0.000000e+00> : vector<8x256xf32>
    %67 = tpu.matmul %66, %60, %cst_45 {dimension_numbers = #tpu.dot_dimension_numbers<[1], [0], [0], [1], [0, 0, 1, 1], [], []>} : vector<8x256xf32>, vector<256x256xf32>, vector<8x256xf32> -> vector<8x256xf32>
    %68 = vector.broadcast %62 : vector<1x256xf32> to vector<8x256xf32>
    %69 = arith.addf %67, %68 : vector<8x256xf32>
    %70 = vector.extract_strided_slice %69 {offsets = [0, 0], sizes = [8, 128], strides = [1, 1]} : vector<8x256xf32> to vector<8x128xf32>
    %71 = math.tanh %70 : vector<8x128xf32>
    %72 = vector.extract_strided_slice %69 {offsets = [0, 128], sizes = [8, 128], strides = [1, 1]} : vector<8x256xf32> to vector<8x128xf32>
    %73 = arith.subf %25, %72 : vector<8x128xf32>
    %cst_46 = arith.constant 0.000000e+00 : f32
    %74 = vector.broadcast %cst_46 : f32 to vector<8x128xf32>
    %75 = arith.subf %74, %71 : vector<8x128xf32>
    %76 = math.exp %75 : vector<8x128xf32>
    %77 = arith.mulf %73, %76 : vector<8x128xf32>
    %cst_47 = arith.constant dense<0.000000e+00> : vector<8xf32>
    %78 = vector.multi_reduction <add>, %71, %cst_47 [1] : vector<8x128xf32> to vector<8xf32>
    %79 = vector.shape_cast %78 : vector<8xf32> to vector<8x1xf32>
    %80 = arith.subf %54, %79 : vector<8x1xf32>
    %c3 = arith.constant 3 : index
    %c0_48 = arith.constant 0 : index
    %c0_49 = arith.constant 0 : index
    %81 = vector.load %arg1[%c3, %c0_48, %c0_49] : memref<4x128x256xf32, #tpu.memory_space<vmem>>, vector<1x128x256xf32>
    %82 = vector.shape_cast %81 : vector<1x128x256xf32> to vector<128x256xf32>
    %c3_50 = arith.constant 3 : index
    %c0_51 = arith.constant 0 : index
    %c0_52 = arith.constant 0 : index
    %83 = vector.load %arg2[%c3_50, %c0_51, %c0_52] : memref<4x1x256xf32, #tpu.memory_space<vmem>>, vector<1x1x256xf32>
    %84 = vector.shape_cast %83 : vector<1x1x256xf32> to vector<1x256xf32>
    %c3_53 = arith.constant 3 : index
    %c0_54 = arith.constant 0 : index
    %c0_55 = arith.constant 0 : index
    %85 = vector.load %arg3[%c3_53, %c0_54, %c0_55] : memref<4x256x256xf32, #tpu.memory_space<vmem>>, vector<1x256x256xf32>
    %86 = vector.shape_cast %85 : vector<1x256x256xf32> to vector<256x256xf32>
    %c3_56 = arith.constant 3 : index
    %c0_57 = arith.constant 0 : index
    %c0_58 = arith.constant 0 : index
    %87 = vector.load %arg4[%c3_56, %c0_57, %c0_58] : memref<4x1x256xf32, #tpu.memory_space<vmem>>, vector<1x1x256xf32>
    %88 = vector.shape_cast %87 : vector<1x1x256xf32> to vector<1x256xf32>
    %cst_59 = arith.constant dense<0.000000e+00> : vector<8x256xf32>
    %89 = tpu.matmul %77, %82, %cst_59 {dimension_numbers = #tpu.dot_dimension_numbers<[1], [0], [0], [1], [0, 0, 1, 1], [], []>} : vector<8x128xf32>, vector<128x256xf32>, vector<8x256xf32> -> vector<8x256xf32>
    %90 = vector.broadcast %84 : vector<1x256xf32> to vector<8x256xf32>
    %91 = arith.addf %89, %90 : vector<8x256xf32>
    %92 = math.tanh %91 : vector<8x256xf32>
    %cst_60 = arith.constant dense<0.000000e+00> : vector<8x256xf32>
    %93 = tpu.matmul %92, %86, %cst_60 {dimension_numbers = #tpu.dot_dimension_numbers<[1], [0], [0], [1], [0, 0, 1, 1], [], []>} : vector<8x256xf32>, vector<256x256xf32>, vector<8x256xf32> -> vector<8x256xf32>
    %94 = vector.broadcast %88 : vector<1x256xf32> to vector<8x256xf32>
    %95 = arith.addf %93, %94 : vector<8x256xf32>
    %96 = vector.extract_strided_slice %95 {offsets = [0, 0], sizes = [8, 128], strides = [1, 1]} : vector<8x256xf32> to vector<8x128xf32>
    %97 = math.tanh %96 : vector<8x128xf32>
    %98 = vector.extract_strided_slice %95 {offsets = [0, 128], sizes = [8, 128], strides = [1, 1]} : vector<8x256xf32> to vector<8x128xf32>
    %99 = arith.subf %51, %98 : vector<8x128xf32>
    %cst_61 = arith.constant 0.000000e+00 : f32
    %100 = vector.broadcast %cst_61 : f32 to vector<8x128xf32>
    %101 = arith.subf %100, %97 : vector<8x128xf32>
    %102 = math.exp %101 : vector<8x128xf32>
    %103 = arith.mulf %99, %102 : vector<8x128xf32>
    %cst_62 = arith.constant dense<0.000000e+00> : vector<8xf32>
    %104 = vector.multi_reduction <add>, %97, %cst_62 [1] : vector<8x128xf32> to vector<8xf32>
    %105 = vector.shape_cast %104 : vector<8xf32> to vector<8x1xf32>
    %106 = arith.subf %80, %105 : vector<8x1xf32>
    %c0_63 = arith.constant 0 : index
    %c0_64 = arith.constant 0 : index
    %107 = vector.load %arg5[%c0_63, %c0_64] : memref<8x256xf32, #tpu.memory_space<vmem>>, vector<8x128xf32>
    tpu.vector_store %arg5[%c0_63, %c0_64], %103 {strides = array<i32>} : memref<8x256xf32, #tpu.memory_space<vmem>>, vector<8x128xf32>,
    %c0_65 = arith.constant 0 : index
    %c128_66 = arith.constant 128 : index
    %108 = vector.load %arg5[%c0_65, %c128_66] : memref<8x256xf32, #tpu.memory_space<vmem>>, vector<8x128xf32>
    tpu.vector_store %arg5[%c0_65, %c128_66], %77 {strides = array<i32>} : memref<8x256xf32, #tpu.memory_space<vmem>>, vector<8x128xf32>,
    %109 = arith.mulf %103, %103 : vector<8x128xf32>
    %cst_67 = arith.constant dense<0.000000e+00> : vector<8xf32>
    %110 = vector.multi_reduction <add>, %109, %cst_67 [1] : vector<8x128xf32> to vector<8xf32>
    %111 = vector.shape_cast %110 : vector<8xf32> to vector<8x1xf32>
    %112 = arith.mulf %77, %77 : vector<8x128xf32>
    %cst_68 = arith.constant dense<0.000000e+00> : vector<8xf32>
    %113 = vector.multi_reduction <add>, %112, %cst_68 [1] : vector<8x128xf32> to vector<8xf32>
    %114 = vector.shape_cast %113 : vector<8xf32> to vector<8x1xf32>
    %115 = arith.addf %111, %114 : vector<8x1xf32>
    %cst_69 = arith.constant -5.000000e-01 : f32
    %116 = vector.broadcast %cst_69 : f32 to vector<8x1xf32>
    %117 = arith.mulf %116, %115 : vector<8x1xf32>
    %cst_70 = arith.constant 235.24826 : f32
    %118 = vector.broadcast %cst_70 : f32 to vector<8x1xf32>
    %119 = arith.subf %117, %118 : vector<8x1xf32>
    %120 = arith.addf %119, %106 : vector<8x1xf32>
    %cst_71 = arith.constant 0.000000e+00 : f32
    %121 = vector.broadcast %cst_71 : f32 to vector<8x1xf32>
    %122 = arith.subf %121, %120 : vector<8x1xf32>
    %123 = vector.shape_cast %122 : vector<8x1xf32> to vector<1x8x1xf32>
    %cst_72 = arith.constant dense<0.000000e+00> : vector<1xf32>
    %124 = vector.multi_reduction <add>, %123, %cst_72 [1, 2] : vector<1x8x1xf32> to vector<1xf32>
    %125 = vector.shape_cast %124 : vector<1xf32> to vector<1x1x1xf32>
    %126 = vector.extract %125[0, 0, 0] : f32 from vector<1x1x1xf32>
    %c0_73 = arith.constant 0 : index
    %c0_74 = arith.constant 0 : index
    %127 = memref.load %arg6[%c0_73, %c0_74] : memref<1x1xf32, #tpu.memory_space<smem>>
    memref.store %126, %arg6[%c0_73, %c0_74] : memref<1x1xf32, #tpu.memory_space<smem>>
    return
  }
}

</mosaic_0001>

<bundles_post_ra>
// kernel: tpu_custom_call.1
= control target key start
LH: loop header
LB: loop body
LE: loop exit
PB: predicated region body
PF: predicated region fallthrough
CT: control target
= control target key end

     0   :  { %12 = vsyncpa [#allocation3], 0  ;;  %s1541_s0 = inlined_call_operand.hbm [shape: f32[8,256], index: 0, kind: input, shape index: {}]   ;;  %s1542_s1 = inlined_call_operand.hbm [shape: f32[4,128,256], index: 1, kind: input, shape index: {}]   ;;  %s1543_s2 = inlined_call_operand.hbm [shape: f32[4,1,256], index: 2, kind: input, shape index: {}]   ;;  %s1544_s3 = inlined_call_operand.hbm [shape: f32[4,256,256], index: 3, kind: input, shape index: {}]   ;;  %s1545_s4 = inlined_call_operand.hbm [shape: f32[4,1,256], index: 4, kind: input, shape index: {}]   ;;  %s1546_s5 = inlined_call_operand.hbm [shape: f32[8,256], index: 5, kind: output, shape index: {0}]   ;;  %s1547_s6 = inlined_call_operand.hbm [shape: f32[1,1], index: 6, kind: output, shape index: {1}]  }
   0x1   :  { %13 = vsyncpa [#allocation7], 0 }
   0x2   :  { %14 = vsyncpa [#allocation10], 0 }
   0x3   :  { %15 = vsyncpa [#allocation4], 0 }
   0x4   :  { %16 = vsyncpa [#allocation5], 0  ;;  %s1437_s21 = smov [#allocation6]  }
   0x5   :  { %s32_s22 = sshll.u32 %s1437_s21, 4  ;;  %s33_s22 = int_to_ptr.vmem [resolvable:$true] %s32_s22 }
   0x6   :  { %s1307_s23 = scalar_lea.vmem %s33_s22, 16384  ;;  %p1312_p1 = scmp.lt.s32.totalorder %s33_s22, %s33_s22 }
   0x7   :  { %p1308_p0 = scmp.ne.s32.totalorder %s33_s22, %s1307_s23  ;;  %p1313_p2 = scmp.lt.s32.totalorder %s1307_s23, %s1307_s23 }
   0x9   :  { %p1314_p3 = por %p1313_p2, %p1312_p1 }
   0xb   :  { %p1315_p4 = pnand %p1314_p3, %p1308_p0 }
   0xd   :  { %1318 = shalt.err (!%p1315_p4)
}
   0xe   :  { %s1438_s24 = smov 256   ;;  %s1439_s25 = smov 16  }
   0xf   :  { %38 = dma.hbm_to_vmem [thread:$0]  %s1542_s1, 16384, %s33_s22, [#allocation7], %s1438_s24, %s1438_s24, %s1439_s25  }
  0x10   :  { %s1440_s28 = smov [#allocation9]   ;;  %s1441_s30 = smov [#allocation2]  }
  0x11   :  { %s56_s29 = sshll.u32 %s1440_s28, 4  ;;  %s23_s7 = sshll.u32 %s1441_s30, 4  ;;  %s57_s29 = int_to_ptr.vmem [resolvable:$true] %s56_s29  ;;  %s24_s7 = int_to_ptr.vmem [resolvable:$true] %s23_s7 }
  0x12   :  { %s1327_s8 = scalar_lea.vmem %s57_s29, 32768  ;;  %p1332_p6 = scmp.lt.s32.totalorder %s57_s29, %s57_s29 }
  0x13   :  { %p1328_p5 = scmp.ne.s32.totalorder %s57_s29, %s1327_s8  ;;  %p1333_p7 = scmp.lt.s32.totalorder %s1327_s8, %s1327_s8 }
  0x15   :  { %p1334_p8 = por %p1333_p7, %p1332_p6 }
  0x17   :  { %p1335_p9 = pnand %p1334_p8, %p1328_p5 }
  0x19   :  { %1338 = shalt.err (!%p1335_p9)
}
  0x1a   :  { %62 = dma.hbm_to_vmem [thread:$0]  %s1544_s3, 32768, %s57_s29, [#allocation10], %s1438_s24, %s1438_s24, %s1439_s25  }
  0x1b   :  { %s1347_s11 = scalar_lea.vmem %s24_s7, 256  ;;  %p1352_p11 = scmp.lt.s32.totalorder %s24_s7, %s24_s7 }
  0x1c   :  { %p1348_p10 = scmp.ne.s32.totalorder %s24_s7, %s1347_s11  ;;  %p1353_p12 = scmp.lt.s32.totalorder %s1347_s11, %s1347_s11 }
  0x1e   :  { %p1354_p13 = por %p1353_p12, %p1352_p11 }
  0x20   :  { %p1355_p0 = pnand %p1354_p13, %p1348_p10 }
  0x22   :  { %1358 = shalt.err (!%p1355_p0)
}
  0x23   :  { %26 = dma.hbm_to_vmem [thread:$0]  %s1541_s0, 256, %s24_s7, [#allocation3]  }
  0x24   :  { %s1442_s13 = smov [#allocation8]  }
  0x25   :  { %s44_s14 = sshll.u32 %s1442_s13, 4  ;;  %s45_s14 = int_to_ptr.vmem [resolvable:$true] %s44_s14 }
  0x26   :  { %s1367_s15 = scalar_lea.vmem %s45_s14, 128  ;;  %p1372_p2 = scmp.lt.s32.totalorder %s45_s14, %s45_s14 }
  0x27   :  { %p1368_p1 = scmp.ne.s32.totalorder %s45_s14, %s1367_s15  ;;  %p1373_p3 = scmp.lt.s32.totalorder %s1367_s15, %s1367_s15 }
  0x29   :  { %p1374_p4 = por %p1373_p3, %p1372_p2 }
  0x2b   :  { %p1375_p5 = pnand %p1374_p4, %p1368_p1 }
  0x2d   :  { %1378 = shalt.err (!%p1375_p5)
}
  0x2e   :  { %s1443_s3 = smov 32   ;;  %s1444_s16 = smov 2  }
  0x2f   :  { %50 = dma.hbm_to_vmem [thread:$0]  %s1543_s2, 128, %s45_s14, [#allocation7], %s1443_s3, %s1443_s3, %s1444_s16  }
  0x30   :  { %s1445_s19 = smov [#allocation11]  }
  0x31   :  { %s68_s20 = sshll.u32 %s1445_s19, 4  ;;  %s69_s20 = int_to_ptr.vmem [resolvable:$true] %s68_s20 }
  0x32   :  { %s1387_s0 = scalar_lea.vmem %s69_s20, 128  ;;  %p1392_p7 = scmp.lt.s32.totalorder %s69_s20, %s69_s20 }
  0x33   :  { %p1388_p6 = scmp.ne.s32.totalorder %s69_s20, %s1387_s0  ;;  %p1393_p8 = scmp.lt.s32.totalorder %s1387_s0, %s1387_s0 }
  0x35   :  { %p1394_p9 = por %p1393_p8, %p1392_p7 }
  0x37   :  { %p1395_p10 = pnand %p1394_p9, %p1388_p6 }
  0x39   :  { %1398 = shalt.err (!%p1395_p10)
}
  0x3a   :  { %74 = dma.hbm_to_vmem [thread:$0]  %s1545_s4, 128, %s69_s20, [#allocation10], %s1443_s3, %s1443_s3, %s1444_s16  }
  0x3b   :  { %1427 = dma.done.wait [#allocation3], 256  }
  0x3c   :  { %1428 = vsyncadd [#allocation3], 4294967040 }
  0x3d   :  { %1429 = dma.done.wait [#allocation7], 16512  }
  0x3e   :  { %1430 = vsyncadd [#allocation7], 4294950784 }
  0x3f   :  { %1431 = dma.done.wait [#allocation10], 32896  }
  0x40   :  { %1432 = vsyncadd [#allocation10], 4294934400  ;;  %v1446_v0 = vmov 0.0   ;;  %v123_v1 = vld [vmem:[#allocation6 + $0xf8] sm:$0xff]  ;;  %v122_v2 = vld [vmem:[#allocation6 + $0xf0] sm:$0xff]  ;;  %vm1209_vm0 = vcmask 7168  }
  0x41   :  { %265 = vmatprep.mubr.f32.mxu1 %v1446_v0  ;;  %542 = vmatprep.mubr.f32.mxu0 %v1446_v0  ;;  %v121_v3 = vld [vmem:[#allocation6 + $0xe8] sm:$0xff]  ;;  %v120_v4 = vld [vmem:[#allocation6 + $0xe0] sm:$0xff]  ;;  %v119_v5 = vld [vmem:[#allocation6 + $0xd8] sm:$0xff]  ;;  %s1447_s2 = smov [#allocation12]  }
  0x42   :  { %201 = vmatprep.subr.mxu1 %v123_v1  ;;  %v118_v6 = vld [vmem:[#allocation6 + $0xd0] sm:$0xff]  ;;  %v117_v7 = vld [vmem:[#allocation6 + $0xc8] sm:$0xff]  ;;  %v116_v8 = vld [vmem:[#allocation6 + $0xc0] sm:$0xff]  ;;  %s1228_s4 = sshll.u32 %s1447_s2, 4  ;;  %s1229_s4 = int_to_ptr.vmem [resolvable:$true] %s1228_s4 }
  0x43   :  { %202 = vmatpush1.msra.mxu1 %v122_v2  ;;  %v115_v9 = vld [vmem:[#allocation6 + $0xb8] sm:$0xff]  ;;  %v114_v10 = vld [vmem:[#allocation6 + $0xb0] sm:$0xff]  ;;  %v113_v11 = vld [vmem:[#allocation6 + $0xa8] sm:$0xff]  ;;  %s1399_s23 = scalar_lea.vmem %s1229_s4, 256  ;;  %p1404_p12 = scmp.lt.s32.totalorder %s1229_s4, %s1229_s4 }
  0x44   :  { %203 = vmatprep.subr.mxu1 %v121_v3  ;;  %v112_v12 = vld [vmem:[#allocation6 + $0xa0] sm:$0xff]  ;;  %v111_v13 = vld [vmem:[#allocation6 + $0x98] sm:$0xff]  ;;  %v110_v14 = vld [vmem:[#allocation6 + $0x90] sm:$0xff]  ;;  %p1400_p11 = scmp.ne.s32.totalorder %s1229_s4, %s1399_s23  ;;  %p1405_p13 = scmp.lt.s32.totalorder %s1399_s23, %s1399_s23 }
  0x45   :  { %204 = vmatpush1.msra.mxu1 %v120_v4  ;;  %v109_v15 = vld [vmem:[#allocation6 + $0x88] sm:$0xff]  ;;  %v108_v16 = vld [vmem:[#allocation6 + $0x80] sm:$0xff]  ;;  %v107_v17 = vld [vmem:[#allocation6 + $0x78] sm:$0xff] }
  0x46   :  { %205 = vmatprep.subr.mxu1 %v119_v5  ;;  %v106_v18 = vld [vmem:[#allocation6 + $0x70] sm:$0xff]  ;;  %v105_v19 = vld [vmem:[#allocation6 + $0x68] sm:$0xff]  ;;  %v104_v20 = vld [vmem:[#allocation6 + $0x60] sm:$0xff]  ;;  %p1406_p0 = por %p1405_p13, %p1404_p12 }
  0x47   :  { %206 = vmatpush1.msra.mxu1 %v118_v6  ;;  %v103_v21 = vld [vmem:[#allocation6 + $0x58] sm:$0xff]  ;;  %v102_v22 = vld [vmem:[#allocation6 + $0x50] sm:$0xff]  ;;  %v101_v23 = vld [vmem:[#allocation6 + $0x48] sm:$0xff] }
  0x48   :  { %207 = vmatprep.subr.mxu1 %v117_v7  ;;  %v100_v24 = vld [vmem:[#allocation6 + $0x40] sm:$0xff]  ;;  %v99_v25 = vld [vmem:[#allocation6 + $0x38] sm:$0xff]  ;;  %v98_v26 = vld [vmem:[#allocation6 + $0x30] sm:$0xff]  ;;  %p1407_p1 = pnand %p1406_p0, %p1400_p11 }
  0x49   :  { %208 = vmatpush1.msra.mxu1 %v116_v8  ;;  %v97_v27 = vld [vmem:[#allocation6 + $0x28] sm:$0xff]  ;;  %v96_v28 = vld [vmem:[#allocation6 + $0x20] sm:$0xff]  ;;  %v95_v29 = vld [vmem:[#allocation6 + $0x18] sm:$0xff] }
  0x4a   :  { %209 = vmatprep.subr.mxu1 %v115_v9  ;;  %v94_v30 = vld [vmem:[#allocation6 + $0x10] sm:$0xff]  ;;  %v93_v31 = vld [vmem:[#allocation6 + $0x8] sm:$0xff]  ;;  %v92_v32 = vld [vmem:[#allocation6] sm:$0xff] }
  0x4b   :  { %210 = vmatpush1.msra.mxu1 %v114_v10  ;;  %v1501_v33 = vld [vmem:[#allocation2] sm:$0xff]  ;;  %v156_v34 = vld [vmem:[#allocation9 + $0xf8] sm:$0xff]  ;;  %v155_v35 = vld [vmem:[#allocation9 + $0xf0] sm:$0xff] }
  0x4c   :  { %211 = vmatprep.subr.mxu1 %v113_v11  ;;  %v154_v36 = vld [vmem:[#allocation9 + $0xe8] sm:$0xff]  ;;  %v153_v37 = vld [vmem:[#allocation9 + $0xe0] sm:$0xff]  ;;  %v152_v38 = vld [vmem:[#allocation9 + $0xd8] sm:$0xff] }
  0x4d   :  { %212 = vmatpush1.msra.mxu1 %v112_v12  ;;  %v151_v39 = vld [vmem:[#allocation9 + $0xd0] sm:$0xff]  ;;  %v150_v40 = vld [vmem:[#allocation9 + $0xc8] sm:$0xff]  ;;  %v149_v41 = vld [vmem:[#allocation9 + $0xc0] sm:$0xff] }
  0x4e   :  { %213 = vmatprep.subr.mxu1 %v111_v13  ;;  %v148_v42 = vld [vmem:[#allocation9 + $0xb8] sm:$0xff]  ;;  %v147_v43 = vld [vmem:[#allocation9 + $0xb0] sm:$0xff]  ;;  %v146_v44 = vld [vmem:[#allocation9 + $0xa8] sm:$0xff] }
  0x4f   :  { %214 = vmatpush1.msra.mxu1 %v110_v14  ;;  %v145_v45 = vld [vmem:[#allocation9 + $0xa0] sm:$0xff]  ;;  %v144_v46 = vld [vmem:[#allocation9 + $0x98] sm:$0xff]  ;;  %v143_v47 = vld [vmem:[#allocation9 + $0x90] sm:$0xff] }
  0x50   :  { %215 = vmatprep.subr.mxu1 %v109_v15  ;;  %v142_v48 = vld [vmem:[#allocation9 + $0x88] sm:$0xff]  ;;  %v141_v49 = vld [vmem:[#allocation9 + $0x80] sm:$0xff]  ;;  %v140_v50 = vld [vmem:[#allocation9 + $0x78] sm:$0xff] }
  0x51   :  { %216 = vmatpush1.msra.mxu1 %v108_v16  ;;  %v139_v51 = vld [vmem:[#allocation9 + $0x70] sm:$0xff]  ;;  %v138_v52 = vld [vmem:[#allocation9 + $0x68] sm:$0xff]  ;;  %v137_v53 = vld [vmem:[#allocation9 + $0x60] sm:$0xff] }
  0x52   :  { %217 = vmatprep.subr.mxu1 %v107_v17  ;;  %v136_v54 = vld [vmem:[#allocation9 + $0x58] sm:$0xff]  ;;  %v135_v55 = vld [vmem:[#allocation9 + $0x50] sm:$0xff]  ;;  %v134_v56 = vld [vmem:[#allocation9 + $0x48] sm:$0xff] }
  0x53   :  { %218 = vmatpush1.msra.mxu1 %v106_v18  ;;  %v133_v57 = vld [vmem:[#allocation9 + $0x40] sm:$0xff]  ;;  %v132_v58 = vld [vmem:[#allocation9 + $0x38] sm:$0xff]  ;;  %v131_v59 = vld [vmem:[#allocation9 + $0x30] sm:$0xff] }
  0x54   :  { %219 = vmatprep.subr.mxu1 %v105_v19  ;;  %v130_v60 = vld [vmem:[#allocation9 + $0x28] sm:$0xff]  ;;  %v129_v61 = vld [vmem:[#allocation9 + $0x20] sm:$0xff]  ;;  %v128_v62 = vld [vmem:[#allocation9 + $0x18] sm:$0xff] }
  0x55   :  { %220 = vmatpush1.msra.mxu1 %v104_v20  ;;  %v127_v63 = vld [vmem:[#allocation9 + $0x10] sm:$0xff]  ;;  %v126_v1 = vld [vmem:[#allocation9 + $0x8] sm:$0xff]  ;;  %v125_v2 = vld [vmem:[#allocation9] sm:$0xff] }
  0x56   :  { %221 = vmatprep.subr.mxu1 %v103_v21  ;;  %v188_v3 = vld [vmem:[#allocation9 + $0x1f8] sm:$0xff]  ;;  %v187_v4 = vld [vmem:[#allocation9 + $0x1f0] sm:$0xff]  ;;  %v186_v5 = vld [vmem:[#allocation9 + $0x1e8] sm:$0xff] }
  0x57   :  { %222 = vmatpush1.msra.mxu1 %v102_v22  ;;  %v185_v6 = vld [vmem:[#allocation9 + $0x1e0] sm:$0xff]  ;;  %v184_v7 = vld [vmem:[#allocation9 + $0x1d8] sm:$0xff]  ;;  %v183_v8 = vld [vmem:[#allocation9 + $0x1d0] sm:$0xff] }
  0x58   :  { %223 = vmatprep.subr.mxu1 %v101_v23  ;;  %v182_v9 = vld [vmem:[#allocation9 + $0x1c8] sm:$0xff]  ;;  %v181_v10 = vld [vmem:[#allocation9 + $0x1c0] sm:$0xff]  ;;  %v180_v11 = vld [vmem:[#allocation9 + $0x1b8] sm:$0xff] }
  0x59   :  { %224 = vmatpush1.msra.mxu1 %v100_v24  ;;  %v179_v12 = vld [vmem:[#allocation9 + $0x1b0] sm:$0xff]  ;;  %v178_v13 = vld [vmem:[#allocation9 + $0x1a8] sm:$0xff]  ;;  %v177_v14 = vld [vmem:[#allocation9 + $0x1a0] sm:$0xff] }
  0x5a   :  { %225 = vmatprep.subr.mxu1 %v99_v25  ;;  %v176_v15 = vld [vmem:[#allocation9 + $0x198] sm:$0xff]  ;;  %v175_v16 = vld [vmem:[#allocation9 + $0x190] sm:$0xff]  ;;  %v174_v17 = vld [vmem:[#allocation9 + $0x188] sm:$0xff] }
  0x5b   :  { %226 = vmatpush1.msra.mxu1 %v98_v26  ;;  %v173_v18 = vld [vmem:[#allocation9 + $0x180] sm:$0xff]  ;;  %v172_v19 = vld [vmem:[#allocation9 + $0x178] sm:$0xff]  ;;  %v171_v20 = vld [vmem:[#allocation9 + $0x170] sm:$0xff] }
  0x5c   :  { %227 = vmatprep.subr.mxu1 %v97_v27  ;;  %v170_v21 = vld [vmem:[#allocation9 + $0x168] sm:$0xff]  ;;  %v169_v22 = vld [vmem:[#allocation9 + $0x160] sm:$0xff]  ;;  %v168_v23 = vld [vmem:[#allocation9 + $0x158] sm:$0xff] }
  0x5d   :  { %228 = vmatpush1.msra.mxu1 %v96_v28  ;;  %v167_v24 = vld [vmem:[#allocation9 + $0x150] sm:$0xff]  ;;  %v166_v25 = vld [vmem:[#allocation9 + $0x148] sm:$0xff]  ;;  %v165_v26 = vld [vmem:[#allocation9 + $0x140] sm:$0xff] }
  0x5e   :  { %229 = vmatprep.subr.mxu1 %v95_v29  ;;  %v164_v27 = vld [vmem:[#allocation9 + $0x138] sm:$0xff]  ;;  %v163_v28 = vld [vmem:[#allocation9 + $0x130] sm:$0xff]  ;;  %v162_v29 = vld [vmem:[#allocation9 + $0x128] sm:$0xff] }
  0x5f   :  { %230 = vmatpush1.msra.mxu1 %v94_v30  ;;  %v161_v30 = vld [vmem:[#allocation9 + $0x120] sm:$0xff] }
  0x60   :  { %231 = vmatprep.subr.mxu1 %v93_v31  ;;  %v160_v31 = vld [vmem:[#allocation9 + $0x118] sm:$0xff] }
  0x61   :  { %232 = vmatpush1.msra.mxu1 %v92_v32  ;;  %v159_v32 = vld [vmem:[#allocation9 + $0x110] sm:$0xff] }
  0x62   :  { %266 = vmatmul.mubr.f32.vlgmr.msra.gmra.mxu1 %v1501_v33  ;;  %285 = vmatprep.subr.mxu1 %v156_v34  ;;  %v158_v34 = vld [vmem:[#allocation9 + $0x108] sm:$0xff] }
  0x63   :  { %286 = vmatpush1.msra.mxu1 %v155_v35  ;;  %v157_v35 = vld [vmem:[#allocation9 + $0x100] sm:$0xff] }
  0x64   :  { %287 = vmatprep.subr.mxu1 %v154_v36  ;;  %v191_v36 = vlaneseq }
  0x65   :  { %288 = vmatpush1.msra.mxu1 %v153_v37 }
  0x66   :  { %289 = vmatprep.subr.mxu1 %v152_v38  ;;  %v192_v37 = vshrl.u32 %v191_v36, 7  ;;  %v429_v36 = vld [vmem:[#allocation9 + $0x2e0] sm:$0xff] }
  0x67   :  { %290 = vmatpush1.msra.mxu1 %v151_v39  ;;  %v124_v39 = vld [vmem:[#allocation8] sm:$0x3] }
  0x68   :  { %291 = vmatprep.subr.mxu1 %v150_v40  ;;  %v1504_v38 = vsub.s32 0, %v192_v37  ;;  %v1506_v40 = vsub.s32 1, %v192_v37  ;;  %v428_v37 = vld [vmem:[#allocation9 + $0x2d8] sm:$0xff] }
  0x69   :  { %292 = vmatpush1.msra.mxu1 %v149_v41 }
  0x6a   :  { %293 = vmatprep.subr.mxu1 %v148_v42  ;;  %v194_v41 = vrot.slane %v124_v39, %v1504_v38  ;;  %v198_v42 = vrot.slane %v124_v39, %v1506_v40  ;;  %v427_v39 = vld [vmem:[#allocation9 + $0x2d0] sm:$0xff] }
  0x6b   :  { %294 = vmatpush1.msra.mxu1 %v147_v43 }
  0x6c   :  { %295 = vmatprep.subr.mxu1 %v146_v44 }
  0x6d   :  { %296 = vmatpush1.msra.mxu1 %v145_v45 }
  0x6e   :  { %297 = vmatprep.subr.mxu1 %v144_v46 }
  0x6f   :  { %298 = vmatpush1.msra.mxu1 %v143_v47 }
  0x70   :  { %299 = vmatprep.subr.mxu1 %v142_v48 }
  0x71   :  { %300 = vmatpush1.msra.mxu1 %v141_v49  ;;  %v397_v49 = vld [vmem:[#allocation6 + $0x1f8] sm:$0xff] }
  0x72   :  { %301 = vmatprep.subr.mxu1 %v140_v50  ;;  %478 = vmatprep.subr.mxu0 %v397_v49  ;;  %v396_v50 = vld [vmem:[#allocation6 + $0x1f0] sm:$0xff] }
  0x73   :  { %302 = vmatpush1.msra.mxu1 %v139_v51  ;;  %479 = vmatpush1.msra.mxu0 %v396_v50  ;;  %v395_v51 = vld [vmem:[#allocation6 + $0x1e8] sm:$0xff]  ;;  %v418_v49 = vld [vmem:[#allocation9 + $0x288] sm:$0xff] }
  0x74   :  { %303 = vmatprep.subr.mxu1 %v138_v52  ;;  %480 = vmatprep.subr.mxu0 %v395_v51  ;;  %v394_v52 = vld [vmem:[#allocation6 + $0x1e0] sm:$0xff]  ;;  %v417_v50 = vld [vmem:[#allocation9 + $0x280] sm:$0xff] }
  0x75   :  { %304 = vmatpush1.msra.mxu1 %v137_v53  ;;  %481 = vmatpush1.msra.mxu0 %v394_v52  ;;  %v393_v53 = vld [vmem:[#allocation6 + $0x1d8] sm:$0xff]  ;;  %v416_v51 = vld [vmem:[#allocation9 + $0x278] sm:$0xff] }
  0x76   :  { %305 = vmatprep.subr.mxu1 %v136_v54  ;;  %482 = vmatprep.subr.mxu0 %v393_v53  ;;  %v392_v54 = vld [vmem:[#allocation6 + $0x1d0] sm:$0xff]  ;;  %v415_v52 = vld [vmem:[#allocation9 + $0x270] sm:$0xff] }
  0x77   :  { %306 = vmatpush1.msra.mxu1 %v135_v55  ;;  %483 = vmatpush1.msra.mxu0 %v392_v54  ;;  %v391_v55 = vld [vmem:[#allocation6 + $0x1c8] sm:$0xff]  ;;  %v414_v53 = vld [vmem:[#allocation9 + $0x268] sm:$0xff] }
  0x78   :  { %307 = vmatprep.subr.mxu1 %v134_v56  ;;  %484 = vmatprep.subr.mxu0 %v391_v55  ;;  %v390_v56 = vld [vmem:[#allocation6 + $0x1c0] sm:$0xff]  ;;  %v413_v54 = vld [vmem:[#allocation9 + $0x260] sm:$0xff] }
  0x79   :  { %308 = vmatpush1.msra.mxu1 %v133_v57  ;;  %485 = vmatpush1.msra.mxu0 %v390_v56  ;;  %v389_v57 = vld [vmem:[#allocation6 + $0x1b8] sm:$0xff]  ;;  %v412_v55 = vld [vmem:[#allocation9 + $0x258] sm:$0xff] }
  0x7a   :  { %309 = vmatprep.subr.mxu1 %v132_v58  ;;  %486 = vmatprep.subr.mxu0 %v389_v57  ;;  %v388_v58 = vld [vmem:[#allocation6 + $0x1b0] sm:$0xff]  ;;  %v411_v56 = vld [vmem:[#allocation9 + $0x250] sm:$0xff] }
  0x7b   :  { %310 = vmatpush1.msra.mxu1 %v131_v59  ;;  %487 = vmatpush1.msra.mxu0 %v388_v58  ;;  %v387_v59 = vld [vmem:[#allocation6 + $0x1a8] sm:$0xff]  ;;  %v410_v57 = vld [vmem:[#allocation9 + $0x248] sm:$0xff] }
  0x7c   :  { %311 = vmatprep.subr.mxu1 %v130_v60  ;;  %488 = vmatprep.subr.mxu0 %v387_v59  ;;  %v386_v60 = vld [vmem:[#allocation6 + $0x1a0] sm:$0xff]  ;;  %v409_v58 = vld [vmem:[#allocation9 + $0x240] sm:$0xff] }
  0x7d   :  { %312 = vmatpush1.msra.mxu1 %v129_v61  ;;  %489 = vmatpush1.msra.mxu0 %v386_v60  ;;  %v385_v61 = vld [vmem:[#allocation6 + $0x198] sm:$0xff]  ;;  %v408_v59 = vld [vmem:[#allocation9 + $0x238] sm:$0xff] }
  0x7e   :  { %313 = vmatprep.subr.mxu1 %v128_v62  ;;  %490 = vmatprep.subr.mxu0 %v385_v61  ;;  %v384_v62 = vld [vmem:[#allocation6 + $0x190] sm:$0xff]  ;;  %v407_v60 = vld [vmem:[#allocation9 + $0x230] sm:$0xff] }
  0x7f   :  { %314 = vmatpush1.msra.mxu1 %v127_v63  ;;  %491 = vmatpush1.msra.mxu0 %v384_v62  ;;  %v383_v63 = vld [vmem:[#allocation6 + $0x188] sm:$0xff]  ;;  %v406_v61 = vld [vmem:[#allocation9 + $0x228] sm:$0xff] }
  0x80   :  { %315 = vmatprep.subr.mxu1 %v126_v1  ;;  %492 = vmatprep.subr.mxu0 %v383_v63  ;;  %v382_v1 = vld [vmem:[#allocation6 + $0x180] sm:$0xff]  ;;  %v405_v62 = vld [vmem:[#allocation9 + $0x220] sm:$0xff] }
  0x81   :  { %316 = vmatpush1.msra.mxu1 %v125_v2  ;;  %493 = vmatpush1.msra.mxu0 %v382_v1  ;;  %v381_v2 = vld [vmem:[#allocation6 + $0x178] sm:$0xff]  ;;  %v404_v63 = vld [vmem:[#allocation9 + $0x218] sm:$0xff] }
  0x82   :  { %317 = vmatprep.subr.mxu1 %v188_v3  ;;  %494 = vmatprep.subr.mxu0 %v381_v2  ;;  %v380_v3 = vld [vmem:[#allocation6 + $0x170] sm:$0xff]  ;;  %v403_v1 = vld [vmem:[#allocation9 + $0x210] sm:$0xff] }
  0x83   :  { %318 = vmatpush2.msra.mxu1 %v187_v4  ;;  %v379_v4 = vld [vmem:[#allocation6 + $0x168] sm:$0xff]  ;;  %495 = vmatpush1.msra.mxu0 %v380_v3  ;;  %v402_v2 = vld [vmem:[#allocation9 + $0x208] sm:$0xff] }
  0x84   :  { %319 = vmatprep.subr.mxu1 %v186_v5  ;;  %v378_v5 = vld [vmem:[#allocation6 + $0x160] sm:$0xff]  ;;  %496 = vmatprep.subr.mxu0 %v379_v4  ;;  %v401_v3 = vld [vmem:[#allocation9 + $0x200] sm:$0xff] }
  0x85   :  { %320 = vmatpush2.msra.mxu1 %v185_v6  ;;  %v377_v6 = vld [vmem:[#allocation6 + $0x158] sm:$0xff]  ;;  %497 = vmatpush1.msra.mxu0 %v378_v5  ;;  %v464_v4 = vld [vmem:[#allocation9 + $0x3f8] sm:$0xff] }
  0x86   :  { %321 = vmatprep.subr.mxu1 %v184_v7  ;;  %v376_v7 = vld [vmem:[#allocation6 + $0x150] sm:$0xff]  ;;  %498 = vmatprep.subr.mxu0 %v377_v6  ;;  %v463_v5 = vld [vmem:[#allocation9 + $0x3f0] sm:$0xff] }
  0x87   :  { %322 = vmatpush2.msra.mxu1 %v183_v8  ;;  %v375_v8 = vld [vmem:[#allocation6 + $0x148] sm:$0xff]  ;;  %499 = vmatpush1.msra.mxu0 %v376_v7  ;;  %v462_v6 = vld [vmem:[#allocation9 + $0x3e8] sm:$0xff] }
  0x88   :  { %323 = vmatprep.subr.mxu1 %v182_v9  ;;  %v374_v9 = vld [vmem:[#allocation6 + $0x140] sm:$0xff]  ;;  %500 = vmatprep.subr.mxu0 %v375_v8  ;;  %v461_v7 = vld [vmem:[#allocation9 + $0x3e0] sm:$0xff] }
  0x89   :  { %324 = vmatpush2.msra.mxu1 %v181_v10  ;;  %v373_v10 = vld [vmem:[#allocation6 + $0x138] sm:$0xff]  ;;  %501 = vmatpush1.msra.mxu0 %v374_v9  ;;  %v460_v8 = vld [vmem:[#allocation9 + $0x3d8] sm:$0xff] }
  0x8a   :  { %325 = vmatprep.subr.mxu1 %v180_v11  ;;  %v372_v11 = vld [vmem:[#allocation6 + $0x130] sm:$0xff]  ;;  %502 = vmatprep.subr.mxu0 %v373_v10  ;;  %v459_v9 = vld [vmem:[#allocation9 + $0x3d0] sm:$0xff] }
  0x8b   :  { %326 = vmatpush2.msra.mxu1 %v179_v12  ;;  %v371_v12 = vld [vmem:[#allocation6 + $0x128] sm:$0xff]  ;;  %503 = vmatpush1.msra.mxu0 %v372_v11  ;;  %v458_v10 = vld [vmem:[#allocation9 + $0x3c8] sm:$0xff] }
  0x8c   :  { %327 = vmatprep.subr.mxu1 %v178_v13  ;;  %v370_v13 = vld [vmem:[#allocation6 + $0x120] sm:$0xff]  ;;  %504 = vmatprep.subr.mxu0 %v371_v12  ;;  %v457_v11 = vld [vmem:[#allocation9 + $0x3c0] sm:$0xff] }
  0x8d   :  { %328 = vmatpush2.msra.mxu1 %v177_v14  ;;  %v369_v14 = vld [vmem:[#allocation6 + $0x118] sm:$0xff]  ;;  %505 = vmatpush1.msra.mxu0 %v370_v13  ;;  %v456_v12 = vld [vmem:[#allocation9 + $0x3b8] sm:$0xff] }
  0x8e   :  { %329 = vmatprep.subr.mxu1 %v176_v15  ;;  %v368_v15 = vld [vmem:[#allocation6 + $0x110] sm:$0xff]  ;;  %506 = vmatprep.subr.mxu0 %v369_v14  ;;  %v455_v13 = vld [vmem:[#allocation9 + $0x3b0] sm:$0xff] }
  0x8f   :  { %330 = vmatpush2.msra.mxu1 %v175_v16  ;;  %v367_v16 = vld [vmem:[#allocation6 + $0x108] sm:$0xff]  ;;  %507 = vmatpush1.msra.mxu0 %v368_v15  ;;  %v454_v14 = vld [vmem:[#allocation9 + $0x3a8] sm:$0xff] }
  0x90   :  { %331 = vmatprep.subr.mxu1 %v174_v17  ;;  %v366_v17 = vld [vmem:[#allocation6 + $0x100] sm:$0xff]  ;;  %508 = vmatprep.subr.mxu0 %v367_v16  ;;  %v453_v15 = vld [vmem:[#allocation9 + $0x3a0] sm:$0xff] }
  0x91   :  { %332 = vmatpush2.msra.mxu1 %v173_v18  ;;  %509 = vmatpush1.msra.mxu0 %v366_v17  ;;  %v189_v18 = vld [vmem:[#allocation11] sm:$0x3]  ;;  %v452_v16 = vld [vmem:[#allocation9 + $0x398] sm:$0xff]  ;;  %v451_v17 = vld [vmem:[#allocation9 + $0x390] sm:$0xff] }
  0x92   :  { %333 = vmatprep.subr.mxu1 %v172_v19  ;;  %v278_v19 = vrot.slane %v189_v18, %v1504_v38 }
  0x93   :  { %334 = vmatpush2.msra.mxu1 %v171_v20 }
  0x94   :  { %335 = vmatprep.subr.mxu1 %v170_v21 }
  0x95   :  { %336 = vmatpush2.msra.mxu1 %v169_v22 }
  0x96   :  { %337 = vmatprep.subr.mxu1 %v168_v23 }
  0x97   :  { %338 = vmatpush2.msra.mxu1 %v167_v24 }
  0x98   :  { %339 = vmatprep.subr.mxu1 %v166_v25  ;;  %v282_v25 = vrot.slane %v189_v18, %v1506_v40  ;;  %v450_v18 = vld [vmem:[#allocation9 + $0x388] sm:$0xff] }
  0x99   :  { %340 = vmatpush2.msra.mxu1 %v165_v26 }
  0x9a   :  { %341 = vmatprep.subr.mxu1 %v164_v27  ;;  %v432_v27 = vld [vmem:[#allocation9 + $0x2f8] sm:$0xff] }
  0x9b   :  { %342 = vmatpush2.msra.mxu1 %v163_v28  ;;  %562 = vmatprep.subr.mxu0 %v432_v27  ;;  %v441_v27 = vld [vmem:[#allocation9 + $0x340] sm:$0xff] }
  0x9c   :  { %343 = vmatprep.subr.mxu1 %v162_v29  ;;  %v91_v29 = vld [vmem:[#allocation2 + $0x8] sm:$0xff] }
  0x9d   :  { %344 = vmatpush2.msra.mxu1 %v161_v30 }
  0x9e   :  { %345 = vmatprep.subr.mxu1 %v160_v31 }
  0x9f   :  { %346 = vmatpush2.msra.mxu1 %v159_v32 }
  0xa0   :  { %347 = vmatprep.subr.mxu1 %v158_v34  ;;  %v431_v34 = vld [vmem:[#allocation9 + $0x2f0] sm:$0xff] }
  0xa1   :  { %348 = vmatpush2.msra.mxu1 %v157_v35  ;;  %v430_v35 = vld [vmem:[#allocation9 + $0x2e8] sm:$0xff] }
 0x122   :  { %v267_v43 = vpop.f32.mrf.mxu1 }
 0x123   :  { %v268_v44 = vadd.f32 %v267_v43, %v194_v41  ;;  %v426_v41 = vld [vmem:[#allocation9 + $0x2c8] sm:$0xff]  ;;  %v424_v43 = vld [vmem:[#allocation9 + $0x2b8] sm:$0xff] }
 0x124   :  { %v269_v45 = vpop.f32.mrf.mxu1 }
 0x125   :  { %v270_v46 = vadd.f32 %v269_v45, %v198_v42  ;;  %v425_v42 = vld [vmem:[#allocation9 + $0x2c0] sm:$0xff]  ;;  %v422_v45 = vld [vmem:[#allocation9 + $0x2a8] sm:$0xff] }
 0x127   :  { %1267 = vtanh.f32 %v270_v46  ;;  %v421_v46 = vld [vmem:[#allocation9 + $0x2a0] sm:$0xff] }
 0x128   :  { %1269 = vtanh.f32 %v268_v44  ;;  %v423_v44 = vld [vmem:[#allocation9 + $0x2b0] sm:$0xff] }
 0x134   :  { %v1268_v47 = vpop.eup %1267 }
 0x135   :  { %v1270_v48 = vpop.eup %1269  ;;  %349 = vmatprep.mubr.f32.mxu1 %v1268_v47  ;;  %v420_v47 = vld [vmem:[#allocation9 + $0x298] sm:$0xff] }
 0x136   :  { %350 = vmatmul.mubr.f32.vlgmr.msra.gmra.mxu1 %v1270_v48  ;;  %v419_v48 = vld [vmem:[#allocation9 + $0x290] sm:$0xff] }
 0x137   :  { %819 = vmatprep.mubr.f32.mxu1 %v1446_v0 }
 0x1f6   :  { %v351_v20 = vpop.f32.mrf.mxu1 }
 0x1f7   :  { %v352_v21 = vadd.f32 %v351_v20, %v278_v19  ;;  %v449_v19 = vld [vmem:[#allocation9 + $0x380] sm:$0xff]  ;;  %v448_v20 = vld [vmem:[#allocation9 + $0x378] sm:$0xff] }
 0x1f8   :  { %v353_v26 = vpop.f32.mrf.mxu1 }
 0x1f9   :  { %1271 = vtanh.f32 %v352_v21  ;;  %v354_v28 = vadd.f32 %v353_v26, %v282_v25  ;;  %v447_v21 = vld [vmem:[#allocation9 + $0x370] sm:$0xff]  ;;  %v442_v26 = vld [vmem:[#allocation9 + $0x348] sm:$0xff] }
 0x1fa   :  { %v443_v25 = vld [vmem:[#allocation9 + $0x350] sm:$0xff] }
 0x1fb   :  { %v357_v30 = vsub.f32 %v91_v29, %v354_v28  ;;  %v440_v28 = vld [vmem:[#allocation9 + $0x338] sm:$0xff]  ;;  %v439_v29 = vld [vmem:[#allocation9 + $0x330] sm:$0xff] }
 0x206   :  { %v1272_v22 = vpop.eup %1271 }
 0x207   :  { %v358_v23 = vsub.f32 0.0, %v1272_v22  ;;  %362 = vadd.xlane.f32.xlu0 %v1272_v22  ;;  %v446_v22 = vld [vmem:[#allocation9 + $0x368] sm:$0xff] }
 0x209   :  { %v359_v24 = vmul.f32 1.442695, %v358_v23  ;;  %v445_v23 = vld [vmem:[#allocation9 + $0x360] sm:$0xff] }
 0x20b   :  { %1273 = vpow2.f32 %v359_v24  ;;  %v444_v24 = vld [vmem:[#allocation9 + $0x358] sm:$0xff] }
 0x218   :  { %v1274_v31 = vpop.eup %1273 }
 0x219   :  { %v1513_v32 = vmul.f32 %v1274_v31, %v357_v30  ;;  %v438_v30 = vld [vmem:[#allocation9 + $0x328] sm:$0xff]  ;;  %v437_v31 = vld [vmem:[#allocation9 + $0x320] sm:$0xff] }
 0x21b   :  { %543 = vmatmul.mubr.f32.vlgmr.msra.gmra.mxu0 %v1513_v32 }
 0x21c   :  { %563 = vmatpush1.msra.mxu0 %v431_v34  ;;  %v436_v34 = vld [vmem:[#allocation9 + $0x318] sm:$0xff] }
 0x21d   :  { %564 = vmatprep.subr.mxu0 %v430_v35  ;;  %v435_v35 = vld [vmem:[#allocation9 + $0x310] sm:$0xff] }
 0x21e   :  { %565 = vmatpush1.msra.mxu0 %v429_v36  ;;  %v434_v36 = vld [vmem:[#allocation9 + $0x308] sm:$0xff] }
 0x21f   :  { %566 = vmatprep.subr.mxu0 %v428_v37  ;;  %v433_v37 = vld [vmem:[#allocation9 + $0x300] sm:$0xff] }
 0x220   :  { %567 = vmatpush1.msra.mxu0 %v427_v39  ;;  %v399_v39 = vld [vmem:[#allocation8 + $0x2] sm:$0x3] }
 0x221   :  { %568 = vmatprep.subr.mxu0 %v426_v41  ;;  %v471_v41 = vrot.slane %v399_v39, %v1504_v38 }
 0x222   :  { %569 = vmatpush1.msra.mxu0 %v425_v42  ;;  %v475_v42 = vrot.slane %v399_v39, %v1506_v40  ;;  %v703_v39 = vld [vmem:[#allocation9 + $0x4c8] sm:$0xff] }
 0x223   :  { %570 = vmatprep.subr.mxu0 %v424_v43 }
 0x224   :  { %571 = vmatpush1.msra.mxu0 %v423_v44 }
 0x225   :  { %572 = vmatprep.subr.mxu0 %v422_v45 }
 0x226   :  { %573 = vmatpush1.msra.mxu0 %v421_v46 }
 0x227   :  { %574 = vmatprep.subr.mxu0 %v420_v47 }
 0x228   :  { %575 = vmatpush1.msra.mxu0 %v419_v48 }
 0x229   :  { %576 = vmatprep.subr.mxu0 %v418_v49  ;;  %v674_v49 = vld [vmem:[#allocation6 + $0x2f8] sm:$0xff] }
 0x22a   :  { %577 = vmatpush1.msra.mxu0 %v417_v50  ;;  %755 = vmatprep.subr.mxu1 %v674_v49  ;;  %v673_v50 = vld [vmem:[#allocation6 + $0x2f0] sm:$0xff]  ;;  %v693_v49 = vld [vmem:[#allocation9 + $0x478] sm:$0xff] }
 0x22b   :  { %578 = vmatprep.subr.mxu0 %v416_v51  ;;  %756 = vmatpush1.msra.mxu1 %v673_v50  ;;  %v672_v51 = vld [vmem:[#allocation6 + $0x2e8] sm:$0xff]  ;;  %v692_v50 = vld [vmem:[#allocation9 + $0x470] sm:$0xff] }
 0x22c   :  { %579 = vmatpush1.msra.mxu0 %v415_v52  ;;  %757 = vmatprep.subr.mxu1 %v672_v51  ;;  %v671_v52 = vld [vmem:[#allocation6 + $0x2e0] sm:$0xff]  ;;  %v691_v51 = vld [vmem:[#allocation9 + $0x468] sm:$0xff] }
 0x22d   :  { %580 = vmatprep.subr.mxu0 %v414_v53  ;;  %758 = vmatpush1.msra.mxu1 %v671_v52  ;;  %v670_v53 = vld [vmem:[#allocation6 + $0x2d8] sm:$0xff]  ;;  %v690_v52 = vld [vmem:[#allocation9 + $0x460] sm:$0xff] }
 0x22e   :  { %581 = vmatpush1.msra.mxu0 %v413_v54  ;;  %759 = vmatprep.subr.mxu1 %v670_v53  ;;  %v669_v54 = vld [vmem:[#allocation6 + $0x2d0] sm:$0xff]  ;;  %v689_v53 = vld [vmem:[#allocation9 + $0x458] sm:$0xff] }
 0x22f   :  { %582 = vmatprep.subr.mxu0 %v412_v55  ;;  %760 = vmatpush1.msra.mxu1 %v669_v54  ;;  %v668_v55 = vld [vmem:[#allocation6 + $0x2c8] sm:$0xff]  ;;  %v688_v54 = vld [vmem:[#allocation9 + $0x450] sm:$0xff] }
 0x230   :  { %583 = vmatpush1.msra.mxu0 %v411_v56  ;;  %761 = vmatprep.subr.mxu1 %v668_v55  ;;  %v667_v56 = vld [vmem:[#allocation6 + $0x2c0] sm:$0xff]  ;;  %v687_v55 = vld [vmem:[#allocation9 + $0x448] sm:$0xff] }
 0x231   :  { %584 = vmatprep.subr.mxu0 %v410_v57  ;;  %762 = vmatpush1.msra.mxu1 %v667_v56  ;;  %v666_v57 = vld [vmem:[#allocation6 + $0x2b8] sm:$0xff]  ;;  %v686_v56 = vld [vmem:[#allocation9 + $0x440] sm:$0xff] }
 0x232   :  { %585 = vmatpush1.msra.mxu0 %v409_v58  ;;  %763 = vmatprep.subr.mxu1 %v666_v57  ;;  %v665_v58 = vld [vmem:[#allocation6 + $0x2b0] sm:$0xff]  ;;  %v685_v57 = vld [vmem:[#allocation9 + $0x438] sm:$0xff] }
 0x233   :  { %586 = vmatprep.subr.mxu0 %v408_v59  ;;  %764 = vmatpush1.msra.mxu1 %v665_v58  ;;  %v663_v59 = vld [vmem:[#allocation6 + $0x2a0] sm:$0xff]  ;;  %v684_v58 = vld [vmem:[#allocation9 + $0x430] sm:$0xff] }
 0x234   :  { %587 = vmatpush1.msra.mxu0 %v407_v60  ;;  %v662_v60 = vld [vmem:[#allocation6 + $0x298] sm:$0xff] }
 0x235   :  { %588 = vmatprep.subr.mxu0 %v406_v61  ;;  %v661_v61 = vld [vmem:[#allocation6 + $0x290] sm:$0xff] }
 0x236   :  { %589 = vmatpush1.msra.mxu0 %v405_v62  ;;  %v660_v62 = vld [vmem:[#allocation6 + $0x288] sm:$0xff] }
 0x237   :  { %590 = vmatprep.subr.mxu0 %v404_v63  ;;  %v659_v63 = vld [vmem:[#allocation6 + $0x280] sm:$0xff] }
 0x238   :  { %591 = vmatpush1.msra.mxu0 %v403_v1  ;;  %v658_v1 = vld [vmem:[#allocation6 + $0x278] sm:$0xff] }
 0x239   :  { %592 = vmatprep.subr.mxu0 %v402_v2  ;;  %v657_v2 = vld [vmem:[#allocation6 + $0x270] sm:$0xff] }
 0x23a   :  { %593 = vmatpush1.msra.mxu0 %v401_v3  ;;  %v656_v3 = vld [vmem:[#allocation6 + $0x268] sm:$0xff] }
 0x23b   :  { %594 = vmatprep.subr.mxu0 %v464_v4  ;;  %v655_v4 = vld [vmem:[#allocation6 + $0x260] sm:$0xff] }
 0x23c   :  { %595 = vmatpush2.msra.mxu0 %v463_v5  ;;  %v654_v5 = vld [vmem:[#allocation6 + $0x258] sm:$0xff] }
 0x23d   :  { %596 = vmatprep.subr.mxu0 %v462_v6  ;;  %v653_v6 = vld [vmem:[#allocation6 + $0x250] sm:$0xff] }
 0x23e   :  { %597 = vmatpush2.msra.mxu0 %v461_v7  ;;  %v652_v7 = vld [vmem:[#allocation6 + $0x248] sm:$0xff] }
 0x23f   :  { %598 = vmatprep.subr.mxu0 %v460_v8  ;;  %v651_v8 = vld [vmem:[#allocation6 + $0x240] sm:$0xff] }
 0x240   :  { %599 = vmatpush2.msra.mxu0 %v459_v9  ;;  %v650_v9 = vld [vmem:[#allocation6 + $0x238] sm:$0xff] }
 0x241   :  { %600 = vmatprep.subr.mxu0 %v458_v10  ;;  %v649_v10 = vld [vmem:[#allocation6 + $0x230] sm:$0xff] }
 0x242   :  { %601 = vmatpush2.msra.mxu0 %v457_v11  ;;  %v648_v11 = vld [vmem:[#allocation6 + $0x228] sm:$0xff] }
 0x243   :  { %602 = vmatprep.subr.mxu0 %v456_v12  ;;  %v647_v12 = vld [vmem:[#allocation6 + $0x220] sm:$0xff] }
 0x244   :  { %603 = vmatpush2.msra.mxu0 %v455_v13  ;;  %v646_v13 = vld [vmem:[#allocation6 + $0x218] sm:$0xff] }
 0x245   :  { %604 = vmatprep.subr.mxu0 %v454_v14  ;;  %v645_v14 = vld [vmem:[#allocation6 + $0x210] sm:$0xff] }
 0x246   :  { %605 = vmatpush2.msra.mxu0 %v453_v15  ;;  %v644_v15 = vld [vmem:[#allocation6 + $0x208] sm:$0xff] }
 0x247   :  { %606 = vmatprep.subr.mxu0 %v452_v16  ;;  %v643_v16 = vld [vmem:[#allocation6 + $0x200] sm:$0xff] }
 0x248   :  { %607 = vmatpush2.msra.mxu0 %v451_v17  ;;  %v466_v17 = vld [vmem:[#allocation11 + $0x2] sm:$0x3] }
 0x249   :  { %608 = vmatprep.subr.mxu0 %v450_v18  ;;  %v555_v18 = vrot.slane %v466_v17, %v1504_v38 }
 0x24a   :  { %609 = vmatpush2.msra.mxu0 %v449_v19 }
 0x24b   :  { %610 = vmatprep.subr.mxu0 %v448_v20 }
 0x24c   :  { %611 = vmatpush2.msra.mxu0 %v447_v21 }
 0x24d   :  { %612 = vmatprep.subr.mxu0 %v446_v22 }
 0x24e   :  { %613 = vmatpush2.msra.mxu0 %v445_v23 }
 0x24f   :  { %614 = vmatprep.subr.mxu0 %v444_v24  ;;  %v559_v24 = vrot.slane %v466_v17, %v1506_v40  ;;  %v725_v17 = vld [vmem:[#allocation9 + $0x578] sm:$0xff] }
 0x250   :  { %615 = vmatpush2.msra.mxu0 %v443_v25 }
 0x251   :  { %616 = vmatprep.subr.mxu0 %v442_v26  ;;  %v709_v26 = vld [vmem:[#allocation9 + $0x4f8] sm:$0xff] }
 0x252   :  { %617 = vmatpush2.msra.mxu0 %v441_v27 }
 0x253   :  { %618 = vmatprep.subr.mxu0 %v440_v28 }
 0x254   :  { %619 = vmatpush2.msra.mxu0 %v439_v29 }
 0x255   :  { %620 = vmatprep.subr.mxu0 %v438_v30 }
 0x256   :  { %621 = vmatpush2.msra.mxu0 %v437_v31  ;;  %v708_v31 = vld [vmem:[#allocation9 + $0x4f0] sm:$0xff] }
 0x257   :  { %622 = vmatprep.subr.mxu0 %v436_v34  ;;  %v707_v34 = vld [vmem:[#allocation9 + $0x4e8] sm:$0xff] }
 0x258   :  { %623 = vmatpush2.msra.mxu0 %v435_v35  ;;  %v706_v35 = vld [vmem:[#allocation9 + $0x4e0] sm:$0xff] }
 0x259   :  { %624 = vmatprep.subr.mxu0 %v434_v36  ;;  %v705_v36 = vld [vmem:[#allocation9 + $0x4d8] sm:$0xff] }
 0x25a   :  { %625 = vmatpush2.msra.mxu0 %v433_v37  ;;  %v704_v37 = vld [vmem:[#allocation9 + $0x4d0] sm:$0xff] }
 0x2db   :  { %v544_v43 = vpop.f32.mrf.mxu0 }
 0x2dc   :  { %v545_v44 = vadd.f32 %v544_v43, %v471_v41  ;;  %v702_v41 = vld [vmem:[#allocation9 + $0x4c0] sm:$0xff]  ;;  %v699_v43 = vld [vmem:[#allocation9 + $0x4a8] sm:$0xff] }
 0x2dd   :  { %v546_v45 = vpop.f32.mrf.mxu0 }
 0x2de   :  { %v547_v46 = vadd.f32 %v546_v45, %v475_v42  ;;  %v701_v42 = vld [vmem:[#allocation9 + $0x4b8] sm:$0xff] }
 0x2df   :  { %v697_v45 = vld [vmem:[#allocation9 + $0x498] sm:$0xff] }
 0x2e0   :  { %1275 = vtanh.f32 %v547_v46  ;;  %v696_v46 = vld [vmem:[#allocation9 + $0x490] sm:$0xff] }
 0x2e1   :  { %1277 = vtanh.f32 %v545_v44  ;;  %v698_v44 = vld [vmem:[#allocation9 + $0x4a0] sm:$0xff] }
 0x2ed   :  { %v1276_v47 = vpop.eup %1275 }
 0x2ee   :  { %v1278_v48 = vpop.eup %1277  ;;  %626 = vmatprep.mubr.f32.mxu0 %v1276_v47  ;;  %v695_v47 = vld [vmem:[#allocation9 + $0x488] sm:$0xff] }
 0x2ef   :  { %627 = vmatmul.mubr.f32.vlgmr.msra.gmra.mxu0 %v1278_v48  ;;  %v694_v48 = vld [vmem:[#allocation9 + $0x480] sm:$0xff] }
 0x2f0   :  { %1096 = vmatprep.mubr.f32.mxu0 %v1446_v0  ;;  %v664_v0 = vld [vmem:[#allocation6 + $0x2a8] sm:$0xff] }
 0x2f1   :  { %765 = vmatprep.subr.mxu1 %v664_v0  ;;  %v683_v0 = vld [vmem:[#allocation9 + $0x428] sm:$0xff] }
 0x2f2   :  { %766 = vmatpush1.msra.mxu1 %v663_v59  ;;  %v682_v59 = vld [vmem:[#allocation9 + $0x420] sm:$0xff] }
 0x2f3   :  { %767 = vmatprep.subr.mxu1 %v662_v60  ;;  %v681_v60 = vld [vmem:[#allocation9 + $0x418] sm:$0xff] }
 0x2f4   :  { %768 = vmatpush1.msra.mxu1 %v661_v61  ;;  %v680_v61 = vld [vmem:[#allocation9 + $0x410] sm:$0xff] }
 0x2f5   :  { %769 = vmatprep.subr.mxu1 %v660_v62  ;;  %v679_v62 = vld [vmem:[#allocation9 + $0x408] sm:$0xff] }
 0x2f6   :  { %770 = vmatpush1.msra.mxu1 %v659_v63  ;;  %v678_v63 = vld [vmem:[#allocation9 + $0x400] sm:$0xff] }
 0x2f7   :  { %771 = vmatprep.subr.mxu1 %v658_v1  ;;  %v741_v1 = vld [vmem:[#allocation9 + $0x5f8] sm:$0xff] }
 0x2f8   :  { %772 = vmatpush1.msra.mxu1 %v657_v2  ;;  %v740_v2 = vld [vmem:[#allocation9 + $0x5f0] sm:$0xff] }
 0x2f9   :  { %773 = vmatprep.subr.mxu1 %v656_v3  ;;  %v739_v3 = vld [vmem:[#allocation9 + $0x5e8] sm:$0xff] }
 0x2fa   :  { %774 = vmatpush1.msra.mxu1 %v655_v4  ;;  %v738_v4 = vld [vmem:[#allocation9 + $0x5e0] sm:$0xff] }
 0x2fb   :  { %775 = vmatprep.subr.mxu1 %v654_v5  ;;  %v737_v5 = vld [vmem:[#allocation9 + $0x5d8] sm:$0xff] }
 0x2fc   :  { %776 = vmatpush1.msra.mxu1 %v653_v6  ;;  %v736_v6 = vld [vmem:[#allocation9 + $0x5d0] sm:$0xff] }
 0x2fd   :  { %777 = vmatprep.subr.mxu1 %v652_v7  ;;  %v735_v7 = vld [vmem:[#allocation9 + $0x5c8] sm:$0xff] }
 0x2fe   :  { %778 = vmatpush1.msra.mxu1 %v651_v8  ;;  %v734_v8 = vld [vmem:[#allocation9 + $0x5c0] sm:$0xff] }
 0x2ff   :  { %779 = vmatprep.subr.mxu1 %v650_v9  ;;  %v733_v9 = vld [vmem:[#allocation9 + $0x5b8] sm:$0xff] }
 0x300   :  { %780 = vmatpush1.msra.mxu1 %v649_v10  ;;  %v732_v10 = vld [vmem:[#allocation9 + $0x5b0] sm:$0xff] }
 0x301   :  { %781 = vmatprep.subr.mxu1 %v648_v11  ;;  %v731_v11 = vld [vmem:[#allocation9 + $0x5a8] sm:$0xff] }
 0x302   :  { %782 = vmatpush1.msra.mxu1 %v647_v12  ;;  %v730_v12 = vld [vmem:[#allocation9 + $0x5a0] sm:$0xff] }
 0x303   :  { %783 = vmatprep.subr.mxu1 %v646_v13  ;;  %v729_v13 = vld [vmem:[#allocation9 + $0x598] sm:$0xff] }
 0x304   :  { %784 = vmatpush1.msra.mxu1 %v645_v14  ;;  %v728_v14 = vld [vmem:[#allocation9 + $0x590] sm:$0xff] }
 0x305   :  { %785 = vmatprep.subr.mxu1 %v644_v15  ;;  %v727_v15 = vld [vmem:[#allocation9 + $0x588] sm:$0xff] }
 0x306   :  { %786 = vmatpush1.msra.mxu1 %v643_v16  ;;  %v726_v16 = vld [vmem:[#allocation9 + $0x580] sm:$0xff] }
 0x307   :  { %839 = vmatprep.subr.mxu1 %v709_v26  ;;  %v716_v26 = vld [vmem:[#allocation9 + $0x530] sm:$0xff] }
 0x3af   :  { %v628_v19 = vpop.f32.mrf.mxu0 }
 0x3b0   :  { %v629_v20 = vadd.f32 %v628_v19, %v555_v18  ;;  %v724_v18 = vld [vmem:[#allocation9 + $0x570] sm:$0xff]  ;;  %v723_v19 = vld [vmem:[#allocation9 + $0x568] sm:$0xff] }
 0x3b1   :  { %v630_v25 = vpop.f32.mrf.mxu0 }
 0x3b2   :  { %1279 = vtanh.f32 %v629_v20  ;;  %v631_v27 = vadd.f32 %v630_v25, %v559_v24  ;;  %v722_v20 = vld [vmem:[#allocation9 + $0x560] sm:$0xff]  ;;  %v717_v25 = vld [vmem:[#allocation9 + $0x538] sm:$0xff] }
 0x3b3   :  { %v718_v24 = vld [vmem:[#allocation9 + $0x540] sm:$0xff] }
 0x3b4   :  { %v634_v28 = vsub.f32 %v1501_v33, %v631_v27  ;;  %v700_v33 = vld [vmem:[#allocation9 + $0x4b0] sm:$0xff]  ;;  %v715_v27 = vld [vmem:[#allocation9 + $0x528] sm:$0xff] }
 0x3bf   :  { %v1280_v21 = vpop.eup %1279 }
 0x3c0   :  { %v635_v22 = vsub.f32 0.0, %v1280_v21  ;;  %639 = vadd.xlane.f32.xlu0 %v1280_v21  ;;  %v721_v21 = vld [vmem:[#allocation9 + $0x558] sm:$0xff] }
 0x3c2   :  { %v636_v23 = vmul.f32 1.442695, %v635_v22  ;;  %v720_v22 = vld [vmem:[#allocation9 + $0x550] sm:$0xff] }
 0x3c4   :  { %1281 = vpow2.f32 %v636_v23  ;;  %v719_v23 = vld [vmem:[#allocation9 + $0x548] sm:$0xff] }
 0x3d1   :  { %v1282_v29 = vpop.eup %1281 }
 0x3d2   :  { %v1522_v30 = vmul.f32 %v1282_v29, %v634_v28  ;;  %v714_v28 = vld [vmem:[#allocation9 + $0x520] sm:$0xff]  ;;  %v713_v29 = vld [vmem:[#allocation9 + $0x518] sm:$0xff] }
 0x3d4   :  { %820 = vmatmul.mubr.f32.vlgmr.msra.gmra.mxu1 %v1522_v30 }
 0x3d5   :  { %840 = vmatpush1.msra.mxu1 %v708_v31  ;;  %v712_v31 = vld [vmem:[#allocation9 + $0x510] sm:$0xff] }
 0x3d6   :  { %841 = vmatprep.subr.mxu1 %v707_v34  ;;  %v711_v34 = vld [vmem:[#allocation9 + $0x508] sm:$0xff] }
 0x3d7   :  { %842 = vmatpush1.msra.mxu1 %v706_v35  ;;  %v710_v35 = vld [vmem:[#allocation9 + $0x500] sm:$0xff] }
 0x3d8   :  { %843 = vmatprep.subr.mxu1 %v705_v36  ;;  %v676_v36 = vld [vmem:[#allocation8 + $0x4] sm:$0x3] }
 0x3d9   :  { %844 = vmatpush1.msra.mxu1 %v704_v37  ;;  %v748_v37 = vrot.slane %v676_v36, %v1504_v38 }
 0x3da   :  { %845 = vmatprep.subr.mxu1 %v703_v39  ;;  %v752_v39 = vrot.slane %v676_v36, %v1506_v40  ;;  %v981_v36 = vld [vmem:[#allocation9 + $0x6d0] sm:$0xff] }
 0x3db   :  { %846 = vmatpush1.msra.mxu1 %v702_v41 }
 0x3dc   :  { %847 = vmatprep.subr.mxu1 %v701_v42 }
 0x3dd   :  { %848 = vmatpush1.msra.mxu1 %v700_v33 }
 0x3de   :  { %849 = vmatprep.subr.mxu1 %v699_v43 }
 0x3df   :  { %850 = vmatpush1.msra.mxu1 %v698_v44 }
 0x3e0   :  { %851 = vmatprep.subr.mxu1 %v697_v45 }
 0x3e1   :  { %852 = vmatpush1.msra.mxu1 %v696_v46  ;;  %v951_v46 = vld [vmem:[#allocation6 + $0x3f8] sm:$0xff] }
 0x3e2   :  { %853 = vmatprep.subr.mxu1 %v695_v47  ;;  %1032 = vmatprep.subr.mxu0 %v951_v46  ;;  %v950_v47 = vld [vmem:[#allocation6 + $0x3f0] sm:$0xff]  ;;  %v971_v46 = vld [vmem:[#allocation9 + $0x680] sm:$0xff] }
 0x3e3   :  { %854 = vmatpush1.msra.mxu1 %v694_v48  ;;  %1033 = vmatpush1.msra.mxu0 %v950_v47  ;;  %v949_v48 = vld [vmem:[#allocation6 + $0x3e8] sm:$0xff]  ;;  %v970_v47 = vld [vmem:[#allocation9 + $0x678] sm:$0xff] }
 0x3e4   :  { %855 = vmatprep.subr.mxu1 %v693_v49  ;;  %1034 = vmatprep.subr.mxu0 %v949_v48  ;;  %v948_v49 = vld [vmem:[#allocation6 + $0x3e0] sm:$0xff]  ;;  %v969_v48 = vld [vmem:[#allocation9 + $0x670] sm:$0xff] }
 0x3e5   :  { %856 = vmatpush1.msra.mxu1 %v692_v50  ;;  %1035 = vmatpush1.msra.mxu0 %v948_v49  ;;  %v947_v50 = vld [vmem:[#allocation6 + $0x3d8] sm:$0xff]  ;;  %v968_v49 = vld [vmem:[#allocation9 + $0x668] sm:$0xff] }
 0x3e6   :  { %857 = vmatprep.subr.mxu1 %v691_v51  ;;  %1036 = vmatprep.subr.mxu0 %v947_v50  ;;  %v946_v51 = vld [vmem:[#allocation6 + $0x3d0] sm:$0xff]  ;;  %v967_v50 = vld [vmem:[#allocation9 + $0x660] sm:$0xff] }
 0x3e7   :  { %858 = vmatpush1.msra.mxu1 %v690_v52  ;;  %1037 = vmatpush1.msra.mxu0 %v946_v51  ;;  %v945_v52 = vld [vmem:[#allocation6 + $0x3c8] sm:$0xff]  ;;  %v966_v51 = vld [vmem:[#allocation9 + $0x658] sm:$0xff] }
 0x3e8   :  { %859 = vmatprep.subr.mxu1 %v689_v53  ;;  %1038 = vmatprep.subr.mxu0 %v945_v52  ;;  %v944_v53 = vld [vmem:[#allocation6 + $0x3c0] sm:$0xff]  ;;  %v965_v52 = vld [vmem:[#allocation9 + $0x650] sm:$0xff] }
 0x3e9   :  { %860 = vmatpush1.msra.mxu1 %v688_v54  ;;  %1039 = vmatpush1.msra.mxu0 %v944_v53  ;;  %v943_v54 = vld [vmem:[#allocation6 + $0x3b8] sm:$0xff]  ;;  %v964_v53 = vld [vmem:[#allocation9 + $0x648] sm:$0xff] }
 0x3ea   :  { %861 = vmatprep.subr.mxu1 %v687_v55  ;;  %1040 = vmatprep.subr.mxu0 %v943_v54  ;;  %v942_v55 = vld [vmem:[#allocation6 + $0x3b0] sm:$0xff]  ;;  %v963_v54 = vld [vmem:[#allocation9 + $0x640] sm:$0xff] }
 0x3eb   :  { %862 = vmatpush1.msra.mxu1 %v686_v56  ;;  %1041 = vmatpush1.msra.mxu0 %v942_v55  ;;  %v941_v56 = vld [vmem:[#allocation6 + $0x3a8] sm:$0xff]  ;;  %v962_v55 = vld [vmem:[#allocation9 + $0x638] sm:$0xff] }
 0x3ec   :  { %863 = vmatprep.subr.mxu1 %v685_v57  ;;  %1042 = vmatprep.subr.mxu0 %v941_v56  ;;  %v940_v57 = vld [vmem:[#allocation6 + $0x3a0] sm:$0xff]  ;;  %v961_v56 = vld [vmem:[#allocation9 + $0x630] sm:$0xff] }
 0x3ed   :  { %864 = vmatpush1.msra.mxu1 %v684_v58  ;;  %1043 = vmatpush1.msra.mxu0 %v940_v57  ;;  %v939_v58 = vld [vmem:[#allocation6 + $0x398] sm:$0xff]  ;;  %v960_v57 = vld [vmem:[#allocation9 + $0x628] sm:$0xff] }
 0x3ee   :  { %865 = vmatprep.subr.mxu1 %v683_v0  ;;  %1044 = vmatprep.subr.mxu0 %v939_v58  ;;  %v938_v0 = vld [vmem:[#allocation6 + $0x390] sm:$0xff]  ;;  %v959_v58 = vld [vmem:[#allocation9 + $0x620] sm:$0xff] }
 0x3ef   :  { %866 = vmatpush1.msra.mxu1 %v682_v59  ;;  %1045 = vmatpush1.msra.mxu0 %v938_v0  ;;  %v937_v59 = vld [vmem:[#allocation6 + $0x388] sm:$0xff]  ;;  %v958_v0 = vld [vmem:[#allocation9 + $0x618] sm:$0xff] }
 0x3f0   :  { %867 = vmatprep.subr.mxu1 %v681_v60  ;;  %1046 = vmatprep.subr.mxu0 %v937_v59  ;;  %v936_v60 = vld [vmem:[#allocation6 + $0x380] sm:$0xff]  ;;  %v957_v59 = vld [vmem:[#allocation9 + $0x610] sm:$0xff] }
 0x3f1   :  { %868 = vmatpush1.msra.mxu1 %v680_v61  ;;  %1047 = vmatpush1.msra.mxu0 %v936_v60  ;;  %v935_v61 = vld [vmem:[#allocation6 + $0x378] sm:$0xff]  ;;  %v956_v60 = vld [vmem:[#allocation9 + $0x608] sm:$0xff] }
 0x3f2   :  { %869 = vmatprep.subr.mxu1 %v679_v62  ;;  %1048 = vmatprep.subr.mxu0 %v935_v61  ;;  %v934_v62 = vld [vmem:[#allocation6 + $0x370] sm:$0xff]  ;;  %v955_v61 = vld [vmem:[#allocation9 + $0x600] sm:$0xff] }
 0x3f3   :  { %870 = vmatpush1.msra.mxu1 %v678_v63  ;;  %1049 = vmatpush1.msra.mxu0 %v934_v62  ;;  %v933_v63 = vld [vmem:[#allocation6 + $0x368] sm:$0xff]  ;;  %v1018_v62 = vld [vmem:[#allocation9 + $0x7f8] sm:$0xff] }
 0x3f4   :  { %871 = vmatprep.subr.mxu1 %v741_v1  ;;  %1050 = vmatprep.subr.mxu0 %v933_v63  ;;  %v932_v1 = vld [vmem:[#allocation6 + $0x360] sm:$0xff]  ;;  %v1017_v63 = vld [vmem:[#allocation9 + $0x7f0] sm:$0xff] }
 0x3f5   :  { %872 = vmatpush2.msra.mxu1 %v740_v2  ;;  %1051 = vmatpush1.msra.mxu0 %v932_v1  ;;  %v931_v2 = vld [vmem:[#allocation6 + $0x358] sm:$0xff]  ;;  %v1016_v1 = vld [vmem:[#allocation9 + $0x7e8] sm:$0xff] }
 0x3f6   :  { %873 = vmatprep.subr.mxu1 %v739_v3  ;;  %1052 = vmatprep.subr.mxu0 %v931_v2  ;;  %v930_v3 = vld [vmem:[#allocation6 + $0x350] sm:$0xff]  ;;  %v1015_v2 = vld [vmem:[#allocation9 + $0x7e0] sm:$0xff] }
 0x3f7   :  { %874 = vmatpush2.msra.mxu1 %v738_v4  ;;  %1053 = vmatpush1.msra.mxu0 %v930_v3  ;;  %v929_v4 = vld [vmem:[#allocation6 + $0x348] sm:$0xff]  ;;  %v1014_v3 = vld [vmem:[#allocation9 + $0x7d8] sm:$0xff] }
 0x3f8   :  { %875 = vmatprep.subr.mxu1 %v737_v5  ;;  %1054 = vmatprep.subr.mxu0 %v929_v4  ;;  %v928_v5 = vld [vmem:[#allocation6 + $0x340] sm:$0xff]  ;;  %v1013_v4 = vld [vmem:[#allocation9 + $0x7d0] sm:$0xff] }
 0x3f9   :  { %876 = vmatpush2.msra.mxu1 %v736_v6  ;;  %1055 = vmatpush1.msra.mxu0 %v928_v5  ;;  %v927_v6 = vld [vmem:[#allocation6 + $0x338] sm:$0xff]  ;;  %v1012_v5 = vld [vmem:[#allocation9 + $0x7c8] sm:$0xff] }
 0x3fa   :  { %877 = vmatprep.subr.mxu1 %v735_v7  ;;  %1056 = vmatprep.subr.mxu0 %v927_v6  ;;  %v926_v7 = vld [vmem:[#allocation6 + $0x330] sm:$0xff]  ;;  %v1011_v6 = vld [vmem:[#allocation9 + $0x7c0] sm:$0xff] }
 0x3fb   :  { %878 = vmatpush2.msra.mxu1 %v734_v8  ;;  %1057 = vmatpush1.msra.mxu0 %v926_v7  ;;  %v925_v8 = vld [vmem:[#allocation6 + $0x328] sm:$0xff]  ;;  %v1010_v7 = vld [vmem:[#allocation9 + $0x7b8] sm:$0xff] }
 0x3fc   :  { %879 = vmatprep.subr.mxu1 %v733_v9  ;;  %1058 = vmatprep.subr.mxu0 %v925_v8  ;;  %v924_v9 = vld [vmem:[#allocation6 + $0x320] sm:$0xff]  ;;  %v1009_v8 = vld [vmem:[#allocation9 + $0x7b0] sm:$0xff] }
 0x3fd   :  { %880 = vmatpush2.msra.mxu1 %v732_v10  ;;  %1059 = vmatpush1.msra.mxu0 %v924_v9  ;;  %v923_v10 = vld [vmem:[#allocation6 + $0x318] sm:$0xff]  ;;  %v1008_v9 = vld [vmem:[#allocation9 + $0x7a8] sm:$0xff] }
 0x3fe   :  { %881 = vmatprep.subr.mxu1 %v731_v11  ;;  %1060 = vmatprep.subr.mxu0 %v923_v10  ;;  %v922_v11 = vld [vmem:[#allocation6 + $0x310] sm:$0xff]  ;;  %v1007_v10 = vld [vmem:[#allocation9 + $0x7a0] sm:$0xff] }
 0x3ff   :  { %882 = vmatpush2.msra.mxu1 %v730_v12  ;;  %1061 = vmatpush1.msra.mxu0 %v922_v11  ;;  %v921_v12 = vld [vmem:[#allocation6 + $0x308] sm:$0xff]  ;;  %v1006_v11 = vld [vmem:[#allocation9 + $0x798] sm:$0xff] }
 0x400   :  { %883 = vmatprep.subr.mxu1 %v729_v13  ;;  %1062 = vmatprep.subr.mxu0 %v921_v12  ;;  %v920_v13 = vld [vmem:[#allocation6 + $0x300] sm:$0xff]  ;;  %v1005_v12 = vld [vmem:[#allocation9 + $0x790] sm:$0xff] }
 0x401   :  { %884 = vmatpush2.msra.mxu1 %v728_v14  ;;  %1063 = vmatpush1.msra.mxu0 %v920_v13  ;;  %v743_v14 = vld [vmem:[#allocation11 + $0x4] sm:$0x3]  ;;  %v1004_v13 = vld [vmem:[#allocation9 + $0x788] sm:$0xff] }
 0x402   :  { %885 = vmatprep.subr.mxu1 %v727_v15  ;;  %v832_v15 = vrot.slane %v743_v14, %v1504_v38 }
 0x403   :  { %886 = vmatpush2.msra.mxu1 %v726_v16 }
 0x404   :  { %887 = vmatprep.subr.mxu1 %v725_v17 }
 0x405   :  { %888 = vmatpush2.msra.mxu1 %v724_v18 }
 0x406   :  { %889 = vmatprep.subr.mxu1 %v723_v19 }
 0x407   :  { %890 = vmatpush2.msra.mxu1 %v722_v20 }
 0x408   :  { %891 = vmatprep.subr.mxu1 %v721_v21  ;;  %v836_v21 = vrot.slane %v743_v14, %v1506_v40  ;;  %v1003_v14 = vld [vmem:[#allocation9 + $0x780] sm:$0xff] }
 0x409   :  { %892 = vmatpush2.msra.mxu1 %v720_v22 }
 0x40a   :  { %893 = vmatprep.subr.mxu1 %v719_v23 }
 0x40b   :  { %894 = vmatpush2.msra.mxu1 %v718_v24 }
 0x40c   :  { %895 = vmatprep.subr.mxu1 %v717_v25 }
 0x40d   :  { %896 = vmatpush2.msra.mxu1 %v716_v26 }
 0x40e   :  { %897 = vmatprep.subr.mxu1 %v715_v27 }
 0x40f   :  { %898 = vmatpush2.msra.mxu1 %v714_v28  ;;  %v986_v28 = vld [vmem:[#allocation9 + $0x6f8] sm:$0xff] }
 0x410   :  { %899 = vmatprep.subr.mxu1 %v713_v29  ;;  %v985_v29 = vld [vmem:[#allocation9 + $0x6f0] sm:$0xff]  ;;  %1116 = vmatprep.subr.mxu0 %v986_v28 }
 0x411   :  { %900 = vmatpush2.msra.mxu1 %v712_v31  ;;  %v984_v31 = vld [vmem:[#allocation9 + $0x6e8] sm:$0xff]  ;;  %v989_v28 = vld [vmem:[#allocation9 + $0x710] sm:$0xff] }
 0x412   :  { %901 = vmatprep.subr.mxu1 %v711_v34  ;;  %v983_v34 = vld [vmem:[#allocation9 + $0x6e0] sm:$0xff] }
 0x413   :  { %902 = vmatpush2.msra.mxu1 %v710_v35  ;;  %v982_v35 = vld [vmem:[#allocation9 + $0x6d8] sm:$0xff] }
 0x494   :  { %v821_v41 = vpop.f32.mrf.mxu1 }
 0x495   :  { %v822_v42 = vadd.f32 %v821_v41, %v748_v37  ;;  %v980_v37 = vld [vmem:[#allocation9 + $0x6c8] sm:$0xff]  ;;  %v977_v41 = vld [vmem:[#allocation9 + $0x6b0] sm:$0xff] }
 0x496   :  { %v823_v33 = vpop.f32.mrf.mxu1 }
 0x497   :  { %v824_v43 = vadd.f32 %v823_v33, %v752_v39  ;;  %v979_v39 = vld [vmem:[#allocation9 + $0x6c0] sm:$0xff] }
 0x498   :  { %v975_v33 = vld [vmem:[#allocation9 + $0x6a0] sm:$0xff] }
 0x499   :  { %1283 = vtanh.f32 %v824_v43  ;;  %v974_v43 = vld [vmem:[#allocation9 + $0x698] sm:$0xff] }
 0x49a   :  { %1285 = vtanh.f32 %v822_v42  ;;  %v976_v42 = vld [vmem:[#allocation9 + $0x6a8] sm:$0xff] }
 0x4a6   :  { %v1284_v44 = vpop.eup %1283 }
 0x4a7   :  { %v1286_v45 = vpop.eup %1285  ;;  %903 = vmatprep.mubr.f32.mxu1 %v1284_v44  ;;  %v973_v44 = vld [vmem:[#allocation9 + $0x690] sm:$0xff] }
 0x4a8   :  { %904 = vmatmul.mubr.f32.vlgmr.msra.gmra.mxu1 %v1286_v45  ;;  %v972_v45 = vld [vmem:[#allocation9 + $0x688] sm:$0xff] }
 0x568   :  { %v905_v16 = vpop.f32.mrf.mxu1 }
 0x569   :  { %v906_v17 = vadd.f32 %v905_v16, %v832_v15  ;;  %v1002_v15 = vld [vmem:[#allocation9 + $0x778] sm:$0xff]  ;;  %v1001_v16 = vld [vmem:[#allocation9 + $0x770] sm:$0xff] }
 0x56a   :  { %v907_v22 = vpop.f32.mrf.mxu1 }
 0x56b   :  { %1287 = vtanh.f32 %v906_v17  ;;  %v908_v23 = vadd.f32 %v907_v22, %v836_v21  ;;  %v1000_v17 = vld [vmem:[#allocation9 + $0x768] sm:$0xff]  ;;  %v995_v22 = vld [vmem:[#allocation9 + $0x740] sm:$0xff] }
 0x56c   :  { %v996_v21 = vld [vmem:[#allocation9 + $0x748] sm:$0xff] }
 0x56d   :  { %v911_v24 = vsub.f32 %v1513_v32, %v908_v23  ;;  %v978_v32 = vld [vmem:[#allocation9 + $0x6b8] sm:$0xff] }
 0x56e   :  { %v994_v23 = vld [vmem:[#allocation9 + $0x738] sm:$0xff] }
 0x578   :  { %v1288_v18 = vpop.eup %1287 }
 0x579   :  { %v912_v19 = vsub.f32 0.0, %v1288_v18  ;;  %916 = vadd.xlane.f32.xlu0 %v1288_v18  ;;  %v999_v18 = vld [vmem:[#allocation9 + $0x760] sm:$0xff] }
 0x57b   :  { %v913_v20 = vmul.f32 1.442695, %v912_v19  ;;  %v998_v19 = vld [vmem:[#allocation9 + $0x758] sm:$0xff] }
 0x57d   :  { %1289 = vpow2.f32 %v913_v20  ;;  %v997_v20 = vld [vmem:[#allocation9 + $0x750] sm:$0xff] }
 0x58a   :  { %v1290_v25 = vpop.eup %1289 }
 0x58b   :  { %v915_v26 = vmul.f32 %v1290_v25, %v911_v24  ;;  %v993_v24 = vld [vmem:[#allocation9 + $0x730] sm:$0xff]  ;;  %v992_v25 = vld [vmem:[#allocation9 + $0x728] sm:$0xff] }
 0x58d   :  { %1197 = vst [vmem:[#allocation12 + $0x8] sm:$0xff] %v915_v26  ;;  %1097 = vmatmul.mubr.f32.vlgmr.msra.gmra.mxu0 %v915_v26  ;;  %v1201_v27 = vmul.f32 %v915_v26, %v915_v26  ;;  %v991_v26 = vld [vmem:[#allocation9 + $0x720] sm:$0xff] }
 0x58e   :  { %1117 = vmatpush1.msra.mxu0 %v985_v29  ;;  %v988_v29 = vld [vmem:[#allocation9 + $0x708] sm:$0xff] }
 0x58f   :  { %1202 = vadd.xlane.f32.xlu1 %v1201_v27  ;;  %1118 = vmatprep.subr.mxu0 %v984_v31  ;;  %v990_v27 = vld [vmem:[#allocation9 + $0x718] sm:$0xff]  ;;  %v987_v31 = vld [vmem:[#allocation9 + $0x700] sm:$0xff] }
 0x590   :  { %1119 = vmatpush1.msra.mxu0 %v983_v34  ;;  %v953_v34 = vld [vmem:[#allocation8 + $0x6] sm:$0x3] }
 0x591   :  { %1120 = vmatprep.subr.mxu0 %v982_v35  ;;  %v1025_v35 = vrot.slane %v953_v34, %v1504_v38 }
 0x592   :  { %1121 = vmatpush1.msra.mxu0 %v981_v36  ;;  %v1029_v36 = vrot.slane %v953_v34, %v1506_v40 }
 0x593   :  { %1122 = vmatprep.subr.mxu0 %v980_v37 }
 0x594   :  { %1123 = vmatpush1.msra.mxu0 %v979_v39 }
 0x595   :  { %1124 = vmatprep.subr.mxu0 %v978_v32 }
 0x596   :  { %1125 = vmatpush1.msra.mxu0 %v977_v41 }
 0x597   :  { %1126 = vmatprep.subr.mxu0 %v976_v42 }
 0x598   :  { %1127 = vmatpush1.msra.mxu0 %v975_v33 }
 0x599   :  { %1128 = vmatprep.subr.mxu0 %v974_v43  ;;  %v1020_v43 = vld [vmem:[#allocation11 + $0x6] sm:$0x3] }
 0x59a   :  { %1129 = vmatpush1.msra.mxu0 %v973_v44  ;;  %v1109_v44 = vrot.slane %v1020_v43, %v1504_v38  ;;  %v363_v38 = vpop.xlane.xlu0 %362 }
 0x59b   :  { %1130 = vmatprep.subr.mxu0 %v972_v45 }
 0x59c   :  { %1131 = vmatpush1.msra.mxu0 %v971_v46 }
 0x59d   :  { %1132 = vmatprep.subr.mxu0 %v970_v47 }
 0x59e   :  { %1133 = vmatpush1.msra.mxu0 %v969_v48 }
 0x59f   :  { %1134 = vmatprep.subr.mxu0 %v968_v49 }
 0x5a0   :  { %1135 = vmatpush1.msra.mxu0 %v967_v50  ;;  %v1113_v50 = vrot.slane %v1020_v43, %v1506_v40 }
 0x5a1   :  { %1136 = vmatprep.subr.mxu0 %v966_v51 }
 0x5a2   :  { %1137 = vmatpush1.msra.mxu0 %v965_v52 }
 0x5a3   :  { %1138 = vmatprep.subr.mxu0 %v964_v53 }
 0x5a4   :  { %1139 = vmatpush1.msra.mxu0 %v963_v54 }
 0x5a5   :  { %1140 = vmatprep.subr.mxu0 %v962_v55 }
 0x5a6   :  { %1141 = vmatpush1.msra.mxu0 %v961_v56 }
 0x5a7   :  { %1142 = vmatprep.subr.mxu0 %v960_v57  ;;  %v640_v57 = vpop.xlane.xlu0 %639 }
 0x5a8   :  { %1143 = vmatpush1.msra.mxu0 %v959_v58 }
 0x5a9   :  { %1144 = vmatprep.subr.mxu0 %v958_v0  ;;  %v364_v0 = vsub.f32 0.0, %v363_v38 }
 0x5aa   :  { %1145 = vmatpush1.msra.mxu0 %v957_v59 }
 0x5ab   :  { %1146 = vmatprep.subr.mxu0 %v956_v60 }
 0x5ac   :  { %1147 = vmatpush1.msra.mxu0 %v955_v61  ;;  %v641_v61 = vsub.f32 %v364_v0, %v640_v57 }
 0x5ad   :  { %1148 = vmatprep.subr.mxu0 %v1018_v62 }
 0x5ae   :  { %1149 = vmatpush2.msra.mxu0 %v1017_v63 }
 0x5af   :  { %1150 = vmatprep.subr.mxu0 %v1016_v1 }
 0x5b0   :  { %1151 = vmatpush2.msra.mxu0 %v1015_v2 }
 0x5b1   :  { %1152 = vmatprep.subr.mxu0 %v1014_v3 }
 0x5b2   :  { %1153 = vmatpush2.msra.mxu0 %v1013_v4 }
 0x5b3   :  { %1154 = vmatprep.subr.mxu0 %v1012_v5 }
 0x5b4   :  { %1155 = vmatpush2.msra.mxu0 %v1011_v6 }
 0x5b5   :  { %1156 = vmatprep.subr.mxu0 %v1010_v7 }
 0x5b6   :  { %1157 = vmatpush2.msra.mxu0 %v1009_v8 }
 0x5b7   :  { %1158 = vmatprep.subr.mxu0 %v1008_v9 }
 0x5b8   :  { %1159 = vmatpush2.msra.mxu0 %v1007_v10 }
 0x5b9   :  { %1160 = vmatprep.subr.mxu0 %v1006_v11 }
 0x5ba   :  { %1161 = vmatpush2.msra.mxu0 %v1005_v12 }
 0x5bb   :  { %1162 = vmatprep.subr.mxu0 %v1004_v13 }
 0x5bc   :  { %1163 = vmatpush2.msra.mxu0 %v1003_v14 }
 0x5bd   :  { %1164 = vmatprep.subr.mxu0 %v1002_v15 }
 0x5be   :  { %1165 = vmatpush2.msra.mxu0 %v1001_v16 }
 0x5bf   :  { %1166 = vmatprep.subr.mxu0 %v1000_v17 }
 0x5c0   :  { %1167 = vmatpush2.msra.mxu0 %v999_v18 }
 0x5c1   :  { %1168 = vmatprep.subr.mxu0 %v998_v19 }
 0x5c2   :  { %1169 = vmatpush2.msra.mxu0 %v997_v20 }
 0x5c3   :  { %1170 = vmatprep.subr.mxu0 %v996_v21 }
 0x5c4   :  { %1171 = vmatpush2.msra.mxu0 %v995_v22 }
 0x5c5   :  { %1172 = vmatprep.subr.mxu0 %v994_v23 }
 0x5c6   :  { %1173 = vmatpush2.msra.mxu0 %v993_v24 }
 0x5c7   :  { %1174 = vmatprep.subr.mxu0 %v992_v25 }
 0x5c8   :  { %1175 = vmatpush2.msra.mxu0 %v991_v26 }
 0x5c9   :  { %1176 = vmatprep.subr.mxu0 %v990_v27 }
 0x5ca   :  { %1177 = vmatpush2.msra.mxu0 %v989_v28 }
 0x5cb   :  { %1178 = vmatprep.subr.mxu0 %v988_v29 }
 0x5cc   :  { %1179 = vmatpush2.msra.mxu0 %v987_v31 }
 0x602   :  { %v917_v59 = vpop.xlane.xlu0 %916 }
 0x603   :  { %v918_v63 = vsub.f32 %v641_v61, %v917_v59 }
 0x618   :  { %v1203_v58 = vpop.xlane.xlu1 %1202 }
 0x64d   :  { %v1098_v37 = vpop.f32.mrf.mxu0 }
 0x64e   :  { %v1099_v39 = vadd.f32 %v1098_v37, %v1025_v35 }
 0x64f   :  { %v1100_v32 = vpop.f32.mrf.mxu0 }
 0x650   :  { %v1101_v41 = vadd.f32 %v1100_v32, %v1029_v36 }
 0x652   :  { %1291 = vtanh.f32 %v1101_v41 }
 0x653   :  { %1293 = vtanh.f32 %v1099_v39 }
 0x65f   :  { %v1292_v42 = vpop.eup %1291 }
 0x660   :  { %v1294_v33 = vpop.eup %1293  ;;  %1180 = vmatprep.mubr.f32.mxu0 %v1292_v42 }
 0x661   :  { %1181 = vmatmul.mubr.f32.vlgmr.msra.gmra.mxu0 %v1294_v33 }
 0x721   :  { %v1182_v45 = vpop.f32.mrf.mxu0 }
 0x722   :  { %v1183_v46 = vadd.f32 %v1182_v45, %v1109_v44 }
 0x723   :  { %v1184_v51 = vpop.f32.mrf.mxu0 }
 0x724   :  { %1295 = vtanh.f32 %v1183_v46  ;;  %v1185_v52 = vadd.f32 %v1184_v51, %v1113_v50 }
 0x726   :  { %v1188_v53 = vsub.f32 %v1522_v30, %v1185_v52 }
 0x731   :  { %v1296_v47 = vpop.eup %1295 }
 0x732   :  { %v1189_v48 = vsub.f32 0.0, %v1296_v47 }
 0x734   :  { %v1190_v49 = vmul.f32 1.442695, %v1189_v48 }
 0x736   :  { %1297 = vpow2.f32 %v1190_v49 }
 0x743   :  { %v1298_v54 = vpop.eup %1297 }
 0x744   :  { %v1192_v55 = vmul.f32 %v1298_v54, %v1188_v53 }
 0x746   :  { %v1198_v56 = vmul.f32 %v1192_v55, %v1192_v55  ;;  %1196 = vst [vmem:[#allocation12] sm:$0xff] %v1192_v55 }
 0x748   :  { %1199 = vadd.xlane.f32.xlu1 %v1198_v56 }
 0x74c   :  { %1193 = vadd.xlane.f32.xlu1 %v1296_v47 }
 0x7d1   :  { %v1200_v60 = vpop.xlane.xlu1 %1199 }
 0x7d2   :  { %v1204_v62 = vadd.f32 %v1203_v58, %v1200_v60 }
 0x7d4   :  { %v1205_v40 = vmul.f32 -0.5, %v1204_v62 }
 0x7d5   :  { %v1194_v1 = vpop.xlane.xlu1 %1193 }
 0x7d6   :  { %v1252_v2 = vadd.f32 -235.24826, %v1205_v40  ;;  %v1195_v3 = vsub.f32 %v918_v63, %v1194_v1 }
 0x7d8   :  { %v1207_v30 = vadd.f32 %v1252_v2, %v1195_v3 }
 0x7da   :  { %v1208_v4 = vsub.f32 0.0, %v1207_v30 }
 0x7dc   :  { %v1210_v5 = vsel %vm1209_vm0, %v1208_v4, 0.0 }
 0x7dd   :  { %1211 = vadd.xlane.f32.xlu0 %v1210_v5 }
 0x7de   :  { %1410 = shalt.err (!%p1407_p1)
}
 0x7df   :  { %1231 = dma.vmem_to_hbm [thread:$0]  %s1229_s4, 256, %s1546_s5, [#allocation4]  }
 0x7e0   :  { %s1448_s27 = smov [#allocation13]  }
 0x866   :  { %v1212_v6 = vpop.xlane.xlu0 %1211 }
 0x867   :  { %v1213_v7 = vrot.slane %v1212_v6, 4 }
 0x869   :  { %v1214_v8 = vadd.f32 %v1213_v7, %v1212_v6 }
 0x86b   :  { %v1215_v9 = vrot.slane %v1214_v8, 2 }
 0x86d   :  { %v1216_v10 = vadd.f32 %v1215_v9, %v1214_v8 }
 0x86f   :  { %v1217_v11 = vrot.slane %v1216_v10, 1 }
 0x871   :  { %v1218_v12 = vadd.f32 %v1217_v11, %v1216_v10 }
 0x873   :  { %1253 = vpush %v1218_v12 }
 0x8a4   :  { %s1254_s26 = spop %1253 }
 0x8a5   :  { %1221 = sst [smem:[#allocation13]] %s1254_s26 }
 0x8a6   :  { %1239 = dma.smem_to_hbm %s1448_s27, 16, %s1547_s6, [#allocation5]  }
 0x8a7   :  { %1433 = dma.done.wait [#allocation4], 256  }
 0x8a8   :  { %1434 = vsyncadd [#allocation4], 4294967040 }
 0x8a9   :  { %1435 = dma.done.wait [#allocation5], 16  }
 0x8aa   :  { %1436 = vsyncadd [#allocation5], 4294967280 }
 0x8ab   :  { %1246 = sfence }
 0x8ac   :  { %1247 = vsyncpa [#allocation3], 1 }
 0x8ad   :  { %1248 = vsyncpa [#allocation7], 1 }
 0x8ae   :  { %1249 = vsyncpa [#allocation10], 1 }
 0x8af   :  { %1250 = vsyncpa [#allocation4], 1 }
 0x8b0   :  { %1251 = vsyncpa [#allocation5], 1 }

</bundles_post_ra>
